<compile_context>
chip_gen: v7x
topology: tpu7x:2x2x1
jax: 0.10.0
libtpu: 0.0.40
codegen_flags: <defaults>
</compile_context>

<pallas_src>
import functools

import jax
import jax.numpy as jnp
from jax.experimental import pallas as pl
from jax.experimental.pallas import tpu as pltpu


def _round_up(x, m):
    return ((x + m - 1) // m) * m


def _fm_block_kernel(at_ref, xt_ref, out_ref, *, num_features, embedding_dim,
                     project_dim):
    """One batch tile.

    at_ref : (E*P, F*E)  Kronecker-expanded projection (shared, resident)
    xt_ref : (F*E, TB)   batch tile, batch in the lane dim
    out_ref: (F*P, TB)   lane-dense output tile
    """
    F, E, P = num_features, embedding_dim, project_dim
    TB = xt_ref.shape[-1]

    # --- contraction 1 on the MXU ------------------------------------------
    # projT[e*P + p, b] = sum_f W[f, p] * x[b, f, e]
    proj = jnp.dot(at_ref[...], xt_ref[...],
                   preferred_element_type=jnp.float32)          # (E*P, TB)
    p3 = proj.reshape(E, P, TB)                                  # (E, P, TB)

    # --- contraction 2 on the VPU (batch in lanes) --------------------------
    # out[f*P + p, b] = sum_e x[b, f, e] * projT[e*P + p, b]
    for f in range(F):                                           # F=14, unrolled
        xf = xt_ref[f * E:(f + 1) * E, :]                        # (E, TB)
        prod = xf[:, None, :] * p3                               # (E, P, TB)
        out_ref[f * P:(f + 1) * P, :] = jnp.sum(
            prod, axis=0).astype(out_ref.dtype)                  # (P, TB)


def fm_block_forward(x, projection_matrix, num_features=14, embedding_dim=16,
                     project_dim=8, block_b=1024):
    """x: (B, num_features*embedding_dim) or (B, num_features, embedding_dim)."""
    F, E, P = num_features, embedding_dim, project_dim
    B = x.shape[0]
    x2 = x.reshape(B, F * E)

    # Batch tile: multiple of 128 (lane-dense), capped by block_b.
    block_b = _round_up(block_b, 128)
    tb = min(block_b, _round_up(B, 128))
    b_pad = _round_up(B, tb)
    if b_pad != B:
        x2 = jnp.pad(x2, ((0, b_pad - B), (0, 0)))

    # Layout plumbing in plain XLA: batch into the lane (last) dimension.
    xt = x2.T                                                    # (F*E, b_pad)

    # Kronecker expansion of W so the first contraction is one 2D matmul:
    # a_t[e*P + p, f*E + g] = W[f, p] * delta(e, g)
    eye = jnp.eye(E, dtype=projection_matrix.dtype)
    a_t = jnp.einsum("fp,eg->epfg", projection_matrix,
                     eye).reshape(E * P, F * E)                  # (E*P, F*E)

    grid = (b_pad // tb,)
    kernel = functools.partial(_fm_block_kernel, num_features=F,
                               embedding_dim=E, project_dim=P)

    # Advisory scheduler hint.
    flops = 2 * b_pad * (E * P) * (F * E) + 2 * b_pad * F * E * P
    bytes_accessed = 4 * (b_pad * (F * E + F * P) + (E * P) * (F * E))

    out_t = pl.pallas_call(
        kernel,
        out_shape=jax.ShapeDtypeStruct((F * P, b_pad), x2.dtype),
        grid=grid,
        in_specs=[
            # Shared projection: full array, same block every step.
            pl.BlockSpec((E * P, F * E), lambda i: (0, 0)),
            # One batch tile (batch in lanes) per grid step.
            pl.BlockSpec((F * E, tb), lambda i: (0, i)),
        ],
        out_specs=pl.BlockSpec((F * P, tb), lambda i: (0, i)),
        compiler_params=pltpu.CompilerParams(
            dimension_semantics=("parallel",),
        ),
        cost_estimate=pl.CostEstimate(
            flops=flops, transcendentals=0, bytes_accessed=bytes_accessed),
    )(a_t, xt)

    # (F*P, b_pad) -> (B, F*P)  == fm_matrix.view(batch_size, -1)
    return out_t.T[:B]


def _reference(x, projection_matrix, num_features, embedding_dim):
    batch = x.shape[0]
    x_fm = x.reshape(batch, num_features, embedding_dim)
    projected = jnp.einsum("bfe,fp->bep", x_fm, projection_matrix)
    fm_matrix = jnp.einsum("bfe,bep->bfp", x_fm, projected)
    return fm_matrix.reshape(batch, -1)


if __name__ == "__main__":
    # Module defaults: num_features=14, embedding_dim=16, project_dim=8
    num_features, embedding_dim, project_dim = 14, 16, 8

    key = jax.random.PRNGKey(0)
    k_x, k_p, k_x2 = jax.random.split(key, 3)

    projection_matrix = jax.random.normal(
        k_p, (num_features, project_dim), dtype=jnp.float32)

    # Small demo shape (flat (B, F*E), as the PyTorch module would .view()).
    batch = 2
    x = jax.random.normal(
        k_x, (batch, num_features * embedding_dim), dtype=jnp.float32)
    out = fm_block_forward(x, projection_matrix, num_features, embedding_dim,
                           project_dim)
    out = jax.block_until_ready(out)
    ref = _reference(x, projection_matrix, num_features, embedding_dim)
    assert out.shape == (batch, num_features * project_dim), out.shape
    assert jnp.allclose(out, ref, atol=5e-4, rtol=5e-4), "mismatch (small batch)"

    # Exercise the multi-step grid + padding path (non-multiple batch).
    batch2 = 300
    x2 = jax.random.normal(
        k_x2, (batch2, num_features * embedding_dim), dtype=jnp.float32)
    out2 = fm_block_forward(x2, projection_matrix, num_features, embedding_dim,
                            project_dim, block_b=128)
    out2 = jax.block_until_ready(out2)
    ref2 = _reference(x2, projection_matrix, num_features, embedding_dim)
    assert out2.shape == (batch2, num_features * project_dim), out2.shape
    assert jnp.allclose(out2, ref2, atol=5e-4, rtol=5e-4), "mismatch (tiled batch)"

    print("KERNEL_OK")
</pallas_src>

<mosaic_0001>
module attributes {stable_mosaic.version = 11 : i64} {
  func.func @_fm_block_kernel(%arg0: i32, %arg1: memref<128x224xf32, #tpu.memory_space<vmem>>, %arg2: memref<224x128xf32, #tpu.memory_space<vmem>>, %arg3: memref<112x128xf32, #tpu.memory_space<vmem>>) attributes {dimension_semantics = [#tpu.dimension_semantics<parallel>], iteration_bounds = array<i64: 1>, scalar_prefetch = 0 : i64, scratch_operands = 0 : i64, tpu.core_type = #tpu.core_type<tc>, window_params = [{pipeline_mode = #tpu.pipeline_mode<synchronous>, transform_indices = @transform_0, window_bounds = array<i64: 128, 224>}, {transform_indices = @transform_1, window_bounds = array<i64: 224, 128>}, {transform_indices = @transform_2, window_bounds = array<i64: 112, 128>}]} {
    %c0 = arith.constant 0 : index
    %c0_0 = arith.constant 0 : index
    %0 = vector.load %arg1[%c0, %c0_0] : memref<128x224xf32, #tpu.memory_space<vmem>>, vector<128x224xf32>
    %c0_1 = arith.constant 0 : index
    %c0_2 = arith.constant 0 : index
    %1 = vector.load %arg2[%c0_1, %c0_2] : memref<224x128xf32, #tpu.memory_space<vmem>>, vector<224x128xf32>
    %cst = arith.constant dense<0.000000e+00> : vector<128x128xf32>
    %2 = tpu.matmul %0, %1, %cst {dimension_numbers = #tpu.dot_dimension_numbers<[1], [0], [0], [1], [0, 0, 1, 1], [], []>} : vector<128x224xf32>, vector<224x128xf32>, vector<128x128xf32> -> vector<128x128xf32>
    %3 = vector.shape_cast %2 : vector<128x128xf32> to vector<16x8x128xf32>
    %c0_3 = arith.constant 0 : index
    %c0_4 = arith.constant 0 : index
    %4 = vector.load %arg2[%c0_3, %c0_4] : memref<224x128xf32, #tpu.memory_space<vmem>>, vector<16x128xf32>
    %5 = vector.shape_cast %4 : vector<16x128xf32> to vector<16x1x128xf32>
    %6 = vector.broadcast %5 : vector<16x1x128xf32> to vector<16x8x128xf32>
    %7 = arith.mulf %6, %3 : vector<16x8x128xf32>
    %cst_5 = arith.constant dense<0.000000e+00> : vector<8x128xf32>
    %8 = vector.multi_reduction <add>, %7, %cst_5 [0] : vector<16x8x128xf32> to vector<8x128xf32>
    %c0_6 = arith.constant 0 : index
    %c0_7 = arith.constant 0 : index
    %9 = vector.load %arg3[%c0_6, %c0_7] : memref<112x128xf32, #tpu.memory_space<vmem>>, vector<8x128xf32>
    tpu.vector_store %arg3[%c0_6, %c0_7], %8 {strides = array<i32>} : memref<112x128xf32, #tpu.memory_space<vmem>>, vector<8x128xf32>,
    %c16 = arith.constant 16 : index
    %c0_8 = arith.constant 0 : index
    %10 = vector.load %arg2[%c16, %c0_8] : memref<224x128xf32, #tpu.memory_space<vmem>>, vector<16x128xf32>
    %11 = vector.shape_cast %10 : vector<16x128xf32> to vector<16x1x128xf32>
    %12 = vector.broadcast %11 : vector<16x1x128xf32> to vector<16x8x128xf32>
    %13 = arith.mulf %12, %3 : vector<16x8x128xf32>
    %cst_9 = arith.constant dense<0.000000e+00> : vector<8x128xf32>
    %14 = vector.multi_reduction <add>, %13, %cst_9 [0] : vector<16x8x128xf32> to vector<8x128xf32>
    %c8 = arith.constant 8 : index
    %c0_10 = arith.constant 0 : index
    %15 = vector.load %arg3[%c8, %c0_10] : memref<112x128xf32, #tpu.memory_space<vmem>>, vector<8x128xf32>
    tpu.vector_store %arg3[%c8, %c0_10], %14 {strides = array<i32>} : memref<112x128xf32, #tpu.memory_space<vmem>>, vector<8x128xf32>,
    %c32 = arith.constant 32 : index
    %c0_11 = arith.constant 0 : index
    %16 = vector.load %arg2[%c32, %c0_11] : memref<224x128xf32, #tpu.memory_space<vmem>>, vector<16x128xf32>
    %17 = vector.shape_cast %16 : vector<16x128xf32> to vector<16x1x128xf32>
    %18 = vector.broadcast %17 : vector<16x1x128xf32> to vector<16x8x128xf32>
    %19 = arith.mulf %18, %3 : vector<16x8x128xf32>
    %cst_12 = arith.constant dense<0.000000e+00> : vector<8x128xf32>
    %20 = vector.multi_reduction <add>, %19, %cst_12 [0] : vector<16x8x128xf32> to vector<8x128xf32>
    %c16_13 = arith.constant 16 : index
    %c0_14 = arith.constant 0 : index
    %21 = vector.load %arg3[%c16_13, %c0_14] : memref<112x128xf32, #tpu.memory_space<vmem>>, vector<8x128xf32>
    tpu.vector_store %arg3[%c16_13, %c0_14], %20 {strides = array<i32>} : memref<112x128xf32, #tpu.memory_space<vmem>>, vector<8x128xf32>,
    %c48 = arith.constant 48 : index
    %c0_15 = arith.constant 0 : index
    %22 = vector.load %arg2[%c48, %c0_15] : memref<224x128xf32, #tpu.memory_space<vmem>>, vector<16x128xf32>
    %23 = vector.shape_cast %22 : vector<16x128xf32> to vector<16x1x128xf32>
    %24 = vector.broadcast %23 : vector<16x1x128xf32> to vector<16x8x128xf32>
    %25 = arith.mulf %24, %3 : vector<16x8x128xf32>
    %cst_16 = arith.constant dense<0.000000e+00> : vector<8x128xf32>
    %26 = vector.multi_reduction <add>, %25, %cst_16 [0] : vector<16x8x128xf32> to vector<8x128xf32>
    %c24 = arith.constant 24 : index
    %c0_17 = arith.constant 0 : index
    %27 = vector.load %arg3[%c24, %c0_17] : memref<112x128xf32, #tpu.memory_space<vmem>>, vector<8x128xf32>
    tpu.vector_store %arg3[%c24, %c0_17], %26 {strides = array<i32>} : memref<112x128xf32, #tpu.memory_space<vmem>>, vector<8x128xf32>,
    %c64 = arith.constant 64 : index
    %c0_18 = arith.constant 0 : index
    %28 = vector.load %arg2[%c64, %c0_18] : memref<224x128xf32, #tpu.memory_space<vmem>>, vector<16x128xf32>
    %29 = vector.shape_cast %28 : vector<16x128xf32> to vector<16x1x128xf32>
    %30 = vector.broadcast %29 : vector<16x1x128xf32> to vector<16x8x128xf32>
    %31 = arith.mulf %30, %3 : vector<16x8x128xf32>
    %cst_19 = arith.constant dense<0.000000e+00> : vector<8x128xf32>
    %32 = vector.multi_reduction <add>, %31, %cst_19 [0] : vector<16x8x128xf32> to vector<8x128xf32>
    %c32_20 = arith.constant 32 : index
    %c0_21 = arith.constant 0 : index
    %33 = vector.load %arg3[%c32_20, %c0_21] : memref<112x128xf32, #tpu.memory_space<vmem>>, vector<8x128xf32>
    tpu.vector_store %arg3[%c32_20, %c0_21], %32 {strides = array<i32>} : memref<112x128xf32, #tpu.memory_space<vmem>>, vector<8x128xf32>,
    %c80 = arith.constant 80 : index
    %c0_22 = arith.constant 0 : index
    %34 = vector.load %arg2[%c80, %c0_22] : memref<224x128xf32, #tpu.memory_space<vmem>>, vector<16x128xf32>
    %35 = vector.shape_cast %34 : vector<16x128xf32> to vector<16x1x128xf32>
    %36 = vector.broadcast %35 : vector<16x1x128xf32> to vector<16x8x128xf32>
    %37 = arith.mulf %36, %3 : vector<16x8x128xf32>
    %cst_23 = arith.constant dense<0.000000e+00> : vector<8x128xf32>
    %38 = vector.multi_reduction <add>, %37, %cst_23 [0] : vector<16x8x128xf32> to vector<8x128xf32>
    %c40 = arith.constant 40 : index
    %c0_24 = arith.constant 0 : index
    %39 = vector.load %arg3[%c40, %c0_24] : memref<112x128xf32, #tpu.memory_space<vmem>>, vector<8x128xf32>
    tpu.vector_store %arg3[%c40, %c0_24], %38 {strides = array<i32>} : memref<112x128xf32, #tpu.memory_space<vmem>>, vector<8x128xf32>,
    %c96 = arith.constant 96 : index
    %c0_25 = arith.constant 0 : index
    %40 = vector.load %arg2[%c96, %c0_25] : memref<224x128xf32, #tpu.memory_space<vmem>>, vector<16x128xf32>
    %41 = vector.shape_cast %40 : vector<16x128xf32> to vector<16x1x128xf32>
    %42 = vector.broadcast %41 : vector<16x1x128xf32> to vector<16x8x128xf32>
    %43 = arith.mulf %42, %3 : vector<16x8x128xf32>
    %cst_26 = arith.constant dense<0.000000e+00> : vector<8x128xf32>
    %44 = vector.multi_reduction <add>, %43, %cst_26 [0] : vector<16x8x128xf32> to vector<8x128xf32>
    %c48_27 = arith.constant 48 : index
    %c0_28 = arith.constant 0 : index
    %45 = vector.load %arg3[%c48_27, %c0_28] : memref<112x128xf32, #tpu.memory_space<vmem>>, vector<8x128xf32>
    tpu.vector_store %arg3[%c48_27, %c0_28], %44 {strides = array<i32>} : memref<112x128xf32, #tpu.memory_space<vmem>>, vector<8x128xf32>,
    %c112 = arith.constant 112 : index
    %c0_29 = arith.constant 0 : index
    %46 = vector.load %arg2[%c112, %c0_29] : memref<224x128xf32, #tpu.memory_space<vmem>>, vector<16x128xf32>
    %47 = vector.shape_cast %46 : vector<16x128xf32> to vector<16x1x128xf32>
    %48 = vector.broadcast %47 : vector<16x1x128xf32> to vector<16x8x128xf32>
    %49 = arith.mulf %48, %3 : vector<16x8x128xf32>
    %cst_30 = arith.constant dense<0.000000e+00> : vector<8x128xf32>
    %50 = vector.multi_reduction <add>, %49, %cst_30 [0] : vector<16x8x128xf32> to vector<8x128xf32>
    %c56 = arith.constant 56 : index
    %c0_31 = arith.constant 0 : index
    %51 = vector.load %arg3[%c56, %c0_31] : memref<112x128xf32, #tpu.memory_space<vmem>>, vector<8x128xf32>
    tpu.vector_store %arg3[%c56, %c0_31], %50 {strides = array<i32>} : memref<112x128xf32, #tpu.memory_space<vmem>>, vector<8x128xf32>,
    %c128 = arith.constant 128 : index
    %c0_32 = arith.constant 0 : index
    %52 = vector.load %arg2[%c128, %c0_32] : memref<224x128xf32, #tpu.memory_space<vmem>>, vector<16x128xf32>
    %53 = vector.shape_cast %52 : vector<16x128xf32> to vector<16x1x128xf32>
    %54 = vector.broadcast %53 : vector<16x1x128xf32> to vector<16x8x128xf32>
    %55 = arith.mulf %54, %3 : vector<16x8x128xf32>
    %cst_33 = arith.constant dense<0.000000e+00> : vector<8x128xf32>
    %56 = vector.multi_reduction <add>, %55, %cst_33 [0] : vector<16x8x128xf32> to vector<8x128xf32>
    %c64_34 = arith.constant 64 : index
    %c0_35 = arith.constant 0 : index
    %57 = vector.load %arg3[%c64_34, %c0_35] : memref<112x128xf32, #tpu.memory_space<vmem>>, vector<8x128xf32>
    tpu.vector_store %arg3[%c64_34, %c0_35], %56 {strides = array<i32>} : memref<112x128xf32, #tpu.memory_space<vmem>>, vector<8x128xf32>,
    %c144 = arith.constant 144 : index
    %c0_36 = arith.constant 0 : index
    %58 = vector.load %arg2[%c144, %c0_36] : memref<224x128xf32, #tpu.memory_space<vmem>>, vector<16x128xf32>
    %59 = vector.shape_cast %58 : vector<16x128xf32> to vector<16x1x128xf32>
    %60 = vector.broadcast %59 : vector<16x1x128xf32> to vector<16x8x128xf32>
    %61 = arith.mulf %60, %3 : vector<16x8x128xf32>
    %cst_37 = arith.constant dense<0.000000e+00> : vector<8x128xf32>
    %62 = vector.multi_reduction <add>, %61, %cst_37 [0] : vector<16x8x128xf32> to vector<8x128xf32>
    %c72 = arith.constant 72 : index
    %c0_38 = arith.constant 0 : index
    %63 = vector.load %arg3[%c72, %c0_38] : memref<112x128xf32, #tpu.memory_space<vmem>>, vector<8x128xf32>
    tpu.vector_store %arg3[%c72, %c0_38], %62 {strides = array<i32>} : memref<112x128xf32, #tpu.memory_space<vmem>>, vector<8x128xf32>,
    %c160 = arith.constant 160 : index
    %c0_39 = arith.constant 0 : index
    %64 = vector.load %arg2[%c160, %c0_39] : memref<224x128xf32, #tpu.memory_space<vmem>>, vector<16x128xf32>
    %65 = vector.shape_cast %64 : vector<16x128xf32> to vector<16x1x128xf32>
    %66 = vector.broadcast %65 : vector<16x1x128xf32> to vector<16x8x128xf32>
    %67 = arith.mulf %66, %3 : vector<16x8x128xf32>
    %cst_40 = arith.constant dense<0.000000e+00> : vector<8x128xf32>
    %68 = vector.multi_reduction <add>, %67, %cst_40 [0] : vector<16x8x128xf32> to vector<8x128xf32>
    %c80_41 = arith.constant 80 : index
    %c0_42 = arith.constant 0 : index
    %69 = vector.load %arg3[%c80_41, %c0_42] : memref<112x128xf32, #tpu.memory_space<vmem>>, vector<8x128xf32>
    tpu.vector_store %arg3[%c80_41, %c0_42], %68 {strides = array<i32>} : memref<112x128xf32, #tpu.memory_space<vmem>>, vector<8x128xf32>,
    %c176 = arith.constant 176 : index
    %c0_43 = arith.constant 0 : index
    %70 = vector.load %arg2[%c176, %c0_43] : memref<224x128xf32, #tpu.memory_space<vmem>>, vector<16x128xf32>
    %71 = vector.shape_cast %70 : vector<16x128xf32> to vector<16x1x128xf32>
    %72 = vector.broadcast %71 : vector<16x1x128xf32> to vector<16x8x128xf32>
    %73 = arith.mulf %72, %3 : vector<16x8x128xf32>
    %cst_44 = arith.constant dense<0.000000e+00> : vector<8x128xf32>
    %74 = vector.multi_reduction <add>, %73, %cst_44 [0] : vector<16x8x128xf32> to vector<8x128xf32>
    %c88 = arith.constant 88 : index
    %c0_45 = arith.constant 0 : index
    %75 = vector.load %arg3[%c88, %c0_45] : memref<112x128xf32, #tpu.memory_space<vmem>>, vector<8x128xf32>
    tpu.vector_store %arg3[%c88, %c0_45], %74 {strides = array<i32>} : memref<112x128xf32, #tpu.memory_space<vmem>>, vector<8x128xf32>,
    %c192 = arith.constant 192 : index
    %c0_46 = arith.constant 0 : index
    %76 = vector.load %arg2[%c192, %c0_46] : memref<224x128xf32, #tpu.memory_space<vmem>>, vector<16x128xf32>
    %77 = vector.shape_cast %76 : vector<16x128xf32> to vector<16x1x128xf32>
    %78 = vector.broadcast %77 : vector<16x1x128xf32> to vector<16x8x128xf32>
    %79 = arith.mulf %78, %3 : vector<16x8x128xf32>
    %cst_47 = arith.constant dense<0.000000e+00> : vector<8x128xf32>
    %80 = vector.multi_reduction <add>, %79, %cst_47 [0] : vector<16x8x128xf32> to vector<8x128xf32>
    %c96_48 = arith.constant 96 : index
    %c0_49 = arith.constant 0 : index
    %81 = vector.load %arg3[%c96_48, %c0_49] : memref<112x128xf32, #tpu.memory_space<vmem>>, vector<8x128xf32>
    tpu.vector_store %arg3[%c96_48, %c0_49], %80 {strides = array<i32>} : memref<112x128xf32, #tpu.memory_space<vmem>>, vector<8x128xf32>,
    %c208 = arith.constant 208 : index
    %c0_50 = arith.constant 0 : index
    %82 = vector.load %arg2[%c208, %c0_50] : memref<224x128xf32, #tpu.memory_space<vmem>>, vector<16x128xf32>
    %83 = vector.shape_cast %82 : vector<16x128xf32> to vector<16x1x128xf32>
    %84 = vector.broadcast %83 : vector<16x1x128xf32> to vector<16x8x128xf32>
    %85 = arith.mulf %84, %3 : vector<16x8x128xf32>
    %cst_51 = arith.constant dense<0.000000e+00> : vector<8x128xf32>
    %86 = vector.multi_reduction <add>, %85, %cst_51 [0] : vector<16x8x128xf32> to vector<8x128xf32>
    %c104 = arith.constant 104 : index
    %c0_52 = arith.constant 0 : index
    %87 = vector.load %arg3[%c104, %c0_52] : memref<112x128xf32, #tpu.memory_space<vmem>>, vector<8x128xf32>
    tpu.vector_store %arg3[%c104, %c0_52], %86 {strides = array<i32>} : memref<112x128xf32, #tpu.memory_space<vmem>>, vector<8x128xf32>,
    return
  }
  func.func @transform_0(%arg0: i32) -> (i32, i32) {
    %c0_i32 = arith.constant 0 : i32
    %c0_i32_0 = arith.constant 0 : i32
    %c0_i32_1 = arith.constant 0 : i32
    return %c0_i32, %c0_i32_0 : i32, i32
  }
  func.func @transform_1(%arg0: i32) -> (i32, i32) {
    %c0_i32 = arith.constant 0 : i32
    %c0_i32_0 = arith.constant 0 : i32
    return %c0_i32, %arg0 : i32, i32
  }
  func.func @transform_2(%arg0: i32) -> (i32, i32) {
    %c0_i32 = arith.constant 0 : i32
    %c0_i32_0 = arith.constant 0 : i32
    return %c0_i32, %arg0 : i32, i32
  }
}

</mosaic_0001>

<bundles_post_ra>
// kernel: tpu_custom_call.1
= control target key start
LH: loop header
LB: loop body
LE: loop exit
PB: predicated region body
PF: predicated region fallthrough
CT: control target
= control target key end

     0   :  { %v3435_v3 = vmov 0.0|0.0   ;;  %vm72_vm0 = vcmask 785408   ;;  %s5985_s0 = inlined_call_operand.vmem [shape: f32[128,224], index: 0, kind: input, shape index: {}]   ;;  %s5986_s1 = inlined_call_operand.vmem [shape: f32[224,128], index: 1, kind: input, shape index: {}]   ;;  %s5987_s2 = inlined_call_operand.hbm [shape: f32[112,128], index: 2, kind: output, shape index: {}]  }
   0x1   :  { %v3458_v0 = vld [vmem:[%s5986_s1] sm:$0xff]  ;;  %v3463_v1 = vld [vmem:[%s5986_s1 + $0x8] sm:$0xff]  ;;  %v3468_v2 = vld [vmem:[%s5986_s1 + $0x10] sm:$0xff]  ;;  %3294 = vmatprep.subr.bf16.mxu0 %v3435_v3  ;;  %3336 = vmatprep.subr.bf16.mxu1 %v3435_v3 }
   0x2   :  { %v3295_v4 = vpack.c.bf16 %v3463_v1, %v3458_v0  ;;  %v3476_v5 = vld [vmem:[%s5986_s1 + $0x18] sm:$0xff]  ;;  %v3485_v7 = vld [vmem:[%s5986_s1 + $0x20] sm:$0xff]  ;;  %v3490_v8 = vld [vmem:[%s5986_s1 + $0x28] sm:$0xff] }
   0x3   :  { %v3298_v6 = vpack.c.bf16 %v3476_v5, %v3468_v2  ;;  %v3301_v9 = vpack.c.bf16 %v3490_v8, %v3485_v7  ;;  %v3499_v10 = vld [vmem:[%s5986_s1 + $0x30] sm:$0xff]  ;;  %v3504_v11 = vld [vmem:[%s5986_s1 + $0x38] sm:$0xff]  ;;  %v13_v12 = vld [vmem:[%s5985_s0 + $0x8] sm:$0xff] }
   0x4   :  { %3296 = vmatpush1.bf16.msra.mxu0 %v3295_v4  ;;  %3350 = vmatpush1.bf16.msra.mxu1 %v3295_v4  ;;  %v3304_v13 = vpack.c.bf16 %v3504_v11, %v3499_v10  ;;  %v3517_v14 = vld [vmem:[%s5986_s1 + $0x40] sm:$0xff]  ;;  %v3522_v15 = vld [vmem:[%s5986_s1 + $0x48] sm:$0xff]  ;;  %v3535_v18 = vld [vmem:[%s5986_s1 + $0x50] sm:$0xff] }
   0x5   :  { %3297 = vmatprep.subr.bf16.mxu0 %v3435_v3  ;;  %3337 = vmatprep.subr.bf16.mxu1 %v3435_v3  ;;  %v29_v16 = vld [vmem:[%s5985_s0 + $0x88] sm:$0xff]  ;;  %v3307_v17 = vpack.c.bf16 %v3522_v15, %v3517_v14  ;;  %v3540_v19 = vld [vmem:[%s5986_s1 + $0x58] sm:$0xff]  ;;  %v3549_v21 = vld [vmem:[%s5986_s1 + $0x60] sm:$0xff] }
   0x6   :  { %3278 = vmatprep.mubr.msk.f32.mxu0 %vm72_vm0, %v13_v12  ;;  %3286 = vmatprep.mubr.msk.f32.mxu1 %vm72_vm0, %v29_v16  ;;  %v3310_v20 = vpack.c.bf16 %v3540_v19, %v3535_v18  ;;  %v3554_v22 = vld [vmem:[%s5986_s1 + $0x68] sm:$0xff] }
   0x8   :  { %3299 = vmatpush1.bf16.msra.mxu0 %v3298_v6  ;;  %3351 = vmatpush1.bf16.msra.mxu1 %v3298_v6 }
   0x9   :  { %3300 = vmatprep.subr.bf16.mxu0 %v3435_v3  ;;  %3338 = vmatprep.subr.bf16.mxu1 %v3435_v3 }
   0xc   :  { %3302 = vmatpush1.bf16.msra.mxu0 %v3301_v9  ;;  %3352 = vmatpush1.bf16.msra.mxu1 %v3301_v9 }
   0xd   :  { %3303 = vmatprep.subr.bf16.mxu0 %v3435_v3  ;;  %3339 = vmatprep.subr.bf16.mxu1 %v3435_v3 }
  0x10   :  { %3305 = vmatpush1.bf16.msra.mxu0 %v3304_v13  ;;  %3353 = vmatpush1.bf16.msra.mxu1 %v3304_v13 }
  0x11   :  { %3306 = vmatprep.subr.bf16.mxu0 %v3435_v3  ;;  %3340 = vmatprep.subr.bf16.mxu1 %v3435_v3 }
  0x14   :  { %3308 = vmatpush1.bf16.msra.mxu0 %v3307_v17  ;;  %3354 = vmatpush1.bf16.msra.mxu1 %v3307_v17 }
  0x15   :  { %3309 = vmatprep.subr.bf16.mxu0 %v3435_v3  ;;  %3341 = vmatprep.subr.bf16.mxu1 %v3435_v3 }
  0x16   :  { %7 = vsyncpa [#allocation3], 0  ;;  %v3313_v23 = vpack.c.bf16 %v3554_v22, %v3549_v21  ;;  %v3563_v24 = vld [vmem:[%s5986_s1 + $0x70] sm:$0xff]  ;;  %v3568_v25 = vld [vmem:[%s5986_s1 + $0x78] sm:$0xff] }
  0x17   :  { %6116 = vst [vmem:[#allocation5_spill] sm:$0xff] %v3563_v24  ;;  %v3316_v26 = vpack.c.bf16 %v3568_v25, %v3563_v24  ;;  %v3577_v27 = vld [vmem:[%s5986_s1 + $0x80] sm:$0xff]  ;;  %v3582_v28 = vld [vmem:[%s5986_s1 + $0x88] sm:$0xff]  ;;  %v3591_v30 = vld [vmem:[%s5986_s1 + $0x90] sm:$0xff] }
  0x18   :  { %3311 = vmatpush1.bf16.msra.mxu0 %v3310_v20  ;;  %3355 = vmatpush1.bf16.msra.mxu1 %v3310_v20  ;;  %6117 = vst [vmem:[#allocation6_spill] sm:$0xff] %v3577_v27  ;;  %v3319_v29 = vpack.c.bf16 %v3582_v28, %v3577_v27  ;;  %6118 = vst [vmem:[#allocation7_spill] sm:$0xff] %v3591_v30  ;;  %v3596_v31 = vld [vmem:[%s5986_s1 + $0x98] sm:$0xff]  ;;  %v3605_v33 = vld [vmem:[%s5986_s1 + $0xa0] sm:$0xff] }
  0x19   :  { %3312 = vmatprep.subr.bf16.mxu0 %v3435_v3  ;;  %3342 = vmatprep.subr.bf16.mxu1 %v3435_v3  ;;  %v3322_v32 = vpack.c.bf16 %v3596_v31, %v3591_v30  ;;  %6119 = vst [vmem:[#allocation8_spill] sm:$0xff] %v3605_v33  ;;  %v3610_v34 = vld [vmem:[%s5986_s1 + $0xa8] sm:$0xff]  ;;  %v3619_v36 = vld [vmem:[%s5986_s1 + $0xb0] sm:$0xff]  ;;  %v3624_v37 = vld [vmem:[%s5986_s1 + $0xb8] sm:$0xff] }
  0x1a   :  { %v3325_v35 = vpack.c.bf16 %v3610_v34, %v3605_v33  ;;  %6120 = vst [vmem:[#allocation9_spill] sm:$0xff] %v3619_v36  ;;  %v3328_v38 = vpack.c.bf16 %v3624_v37, %v3619_v36  ;;  %v3633_v39 = vld [vmem:[%s5986_s1 + $0xc0] sm:$0xff]  ;;  %v3638_v40 = vld [vmem:[%s5986_s1 + $0xc8] sm:$0xff]  ;;  %v3647_v42 = vld [vmem:[%s5986_s1 + $0xd0] sm:$0xff] }
  0x1b   :  { %6121 = vst [vmem:[#allocation10_spill] sm:$0xff] %v3633_v39  ;;  %v3331_v41 = vpack.c.bf16 %v3638_v40, %v3633_v39  ;;  %6122 = vst [vmem:[#allocation11_spill] sm:$0xff] %v3647_v42  ;;  %v3652_v43 = vld [vmem:[%s5986_s1 + $0xd8] sm:$0xff]  ;;  %v12_v45 = vld [vmem:[%s5985_s0] sm:$0xff] }
  0x1c   :  { %3314 = vmatpush1.bf16.msra.mxu0 %v3313_v23  ;;  %3356 = vmatpush1.bf16.msra.mxu1 %v3313_v23  ;;  %v3334_v44 = vpack.c.bf16 %v3652_v43, %v3647_v42  ;;  %v28_v46 = vld [vmem:[%s5985_s0 + $0x80] sm:$0xff]  ;;  %v15_v47 = vld [vmem:[%s5985_s0 + $0x18] sm:$0xff]  ;;  %v14_v49 = vld [vmem:[%s5985_s0 + $0x10] sm:$0xff] }
  0x1d   :  { %3315 = vmatprep.subr.bf16.mxu0 %v3435_v3  ;;  %3343 = vmatprep.subr.bf16.mxu1 %v3435_v3  ;;  %v31_v48 = vld [vmem:[%s5985_s0 + $0x98] sm:$0xff]  ;;  %v30_v50 = vld [vmem:[%s5985_s0 + $0x90] sm:$0xff]  ;;  %v17_v51 = vld [vmem:[%s5985_s0 + $0x28] sm:$0xff] }
  0x1e   :  { %v33_v52 = vld [vmem:[%s5985_s0 + $0xa8] sm:$0xff]  ;;  %v16_v53 = vld [vmem:[%s5985_s0 + $0x20] sm:$0xff]  ;;  %v19_v55 = vld [vmem:[%s5985_s0 + $0x38] sm:$0xff] }
  0x1f   :  { %v32_v54 = vld [vmem:[%s5985_s0 + $0xa0] sm:$0xff]  ;;  %v35_v56 = vld [vmem:[%s5985_s0 + $0xb8] sm:$0xff]  ;;  %v18_v57 = vld [vmem:[%s5985_s0 + $0x30] sm:$0xff] }
  0x20   :  { %3317 = vmatpush1.bf16.msra.mxu0 %v3316_v26  ;;  %3357 = vmatpush1.bf16.msra.mxu1 %v3316_v26  ;;  %v34_v58 = vld [vmem:[%s5985_s0 + $0xb0] sm:$0xff]  ;;  %v21_v59 = vld [vmem:[%s5985_s0 + $0x48] sm:$0xff]  ;;  %v20_v61 = vld [vmem:[%s5985_s0 + $0x40] sm:$0xff] }
  0x21   :  { %3318 = vmatprep.subr.bf16.mxu0 %v3435_v3  ;;  %3344 = vmatprep.subr.bf16.mxu1 %v3435_v3  ;;  %v37_v60 = vld [vmem:[%s5985_s0 + $0xc8] sm:$0xff]  ;;  %v36_v62 = vld [vmem:[%s5985_s0 + $0xc0] sm:$0xff]  ;;  %v23_v63 = vld [vmem:[%s5985_s0 + $0x58] sm:$0xff] }
  0x22   :  { %v22_v4 = vld [vmem:[%s5985_s0 + $0x50] sm:$0xff]  ;;  %v25_v9 = vld [vmem:[%s5985_s0 + $0x68] sm:$0xff]  ;;  %v24_v13 = vld [vmem:[%s5985_s0 + $0x60] sm:$0xff] }
  0x23   :  { %v38_v6 = vld [vmem:[%s5985_s0 + $0xd0] sm:$0xff]  ;;  %v41_v12 = vld [vmem:[%s5985_s0 + $0xe8] sm:$0xff]  ;;  %v40_v16 = vld [vmem:[%s5985_s0 + $0xe0] sm:$0xff] }
  0x24   :  { %3320 = vmatpush1.bf16.msra.mxu0 %v3319_v29  ;;  %3358 = vmatpush1.bf16.msra.mxu1 %v3319_v29  ;;  %v27_v17 = vld [vmem:[%s5985_s0 + $0x78] sm:$0xff]  ;;  %v26_v23 = vld [vmem:[%s5985_s0 + $0x70] sm:$0xff]  ;;  %v3436_v29 = vmov 1966171168  }
  0x25   :  { %3321 = vmatprep.subr.bf16.mxu0 %v3435_v3  ;;  %3345 = vmatprep.subr.bf16.mxu1 %v3435_v3  ;;  %v43_v20 = vld [vmem:[%s5985_s0 + $0xf8] sm:$0xff]  ;;  %v42_v26 = vld [vmem:[%s5985_s0 + $0xf0] sm:$0xff] }
  0x28   :  { %3323 = vmatpush1.bf16.msra.mxu0 %v3322_v32  ;;  %3359 = vmatpush1.bf16.msra.mxu1 %v3322_v32  ;;  %v272_v32 = vunpack.c.l.s4 %v3436_v29 }
  0x29   :  { %3324 = vmatprep.subr.bf16.mxu0 %v3435_v3  ;;  %3346 = vmatprep.subr.bf16.mxu1 %v3435_v3 }
  0x2c   :  { %3326 = vmatpush1.bf16.msra.mxu0 %v3325_v35  ;;  %3360 = vmatpush1.bf16.msra.mxu1 %v3325_v35  ;;  %v274_v35 = vlaneseq }
  0x2d   :  { %3327 = vmatprep.subr.bf16.mxu0 %v3435_v3  ;;  %3347 = vmatprep.subr.bf16.mxu1 %v3435_v3 }
  0x30   :  { %3329 = vmatpush1.bf16.msra.mxu0 %v3328_v38  ;;  %3361 = vmatpush1.bf16.msra.mxu1 %v3328_v38  ;;  %v273_v38 = vunpack.c.0.s8 %v272_v32 }
  0x31   :  { %3330 = vmatprep.subr.bf16.mxu0 %v3435_v3  ;;  %3348 = vmatprep.subr.bf16.mxu1 %v3435_v3 }
  0x34   :  { %3332 = vmatpush1.bf16.msra.mxu0 %v3331_v41  ;;  %3362 = vmatpush1.bf16.msra.mxu1 %v3331_v41  ;;  %v275_v41 = vshrl.u32 %v274_v35, 7 }
  0x35   :  { %3333 = vmatprep.subr.bf16.mxu0 %v3435_v3  ;;  %3349 = vmatprep.subr.bf16.mxu1 %v3435_v3  ;;  %v39_v3 = vld [vmem:[%s5985_s0 + $0xd8] sm:$0xff] }
  0x38   :  { %3335 = vmatpush1.bf16.msra.mxu0 %v3334_v44  ;;  %3363 = vmatpush1.bf16.msra.mxu1 %v3334_v44  ;;  %v3763_v44 = vsub.s32 %v273_v38, %v275_v41 }
  0x3a   :  { %v3059_v29 = vrot.slane %v3647_v42, %v3763_v44 }
  0x3b   :  { %186 = vmatmul.mubr.f32.vlgmr.msra.gmra.mrb[0].mxu0 %v12_v45  ;;  %226 = vmatmul.mubr.f32.vlgmr.msra.gmra.mrb[0].mxu1 %v28_v46  ;;  %v277_v45 = vrot.slane %v3458_v0, %v3763_v44  ;;  %v491_v46 = vrot.slane %v3468_v2, %v3763_v44 }
  0x3c   :  { %3279 = vmatprep.mubr.msk.f32.mxu0 %vm72_vm0, %v15_v47  ;;  %3287 = vmatprep.mubr.msk.f32.mxu1 %vm72_vm0, %v31_v48  ;;  %v705_v47 = vrot.slane %v3485_v7, %v3763_v44  ;;  %v919_v48 = vrot.slane %v3499_v10, %v3763_v44 }
  0x3d   :  { %v285_v32 = vcombine.high %v277_v45, %v277_v45 }
  0x3f   :  { %191 = vmatmul.mubr.f32.gmra.mrb[2].mxu0 %v14_v49  ;;  %231 = vmatmul.mubr.f32.gmra.mrb[2].mxu1 %v30_v50  ;;  %v1133_v49 = vrot.slane %v3517_v14, %v3763_v44  ;;  %v1347_v50 = vrot.slane %v3535_v18, %v3763_v44 }
  0x40   :  { %3280 = vmatprep.mubr.msk.f32.mxu0 %vm72_vm0, %v17_v51  ;;  %3288 = vmatprep.mubr.msk.f32.mxu1 %vm72_vm0, %v33_v52  ;;  %v1561_v51 = vrot.slane %v3549_v21, %v3763_v44  ;;  %v1775_v52 = vrot.slane %v3563_v24, %v3763_v44 }
  0x43   :  { %196 = vmatmul.mubr.f32.gmra.mrb[4].mxu0 %v16_v53  ;;  %236 = vmatmul.mubr.f32.gmra.mrb[4].mxu1 %v32_v54  ;;  %v3782_v53 = vrot.slane %v277_v45, %v3763_v44  ;;  %v3784_v54 = vsub.s32 0, %v275_v41  ;;  %v3854_v45 = vrot.slane %v285_v32, %v3763_v44 }
  0x44   :  { %3281 = vmatprep.mubr.msk.f32.mxu0 %vm72_vm0, %v19_v55  ;;  %3289 = vmatprep.mubr.msk.f32.mxu1 %vm72_vm0, %v35_v56  ;;  %v3787_v55 = vrot.slane %v491_v46, %v3763_v44  ;;  %v3790_v56 = vrot.slane %v705_v47, %v3763_v44 }
  0x45   :  { %6123 = vst [vmem:[#allocation12_spill] sm:$0xff] %v3782_v53  ;;  %6137 = vst [vmem:[#allocation26_spill] sm:$0xff] %v3854_v45 }
  0x46   :  { %6124 = vst [vmem:[#allocation13_spill] sm:$0xff] %v3787_v55  ;;  %6125 = vst [vmem:[#allocation14_spill] sm:$0xff] %v3790_v56 }
  0x47   :  { %201 = vmatmul.mubr.f32.gmra.mrb[6].mxu0 %v18_v57  ;;  %241 = vmatmul.mubr.f32.gmra.mrb[6].mxu1 %v34_v58  ;;  %v3793_v57 = vrot.slane %v919_v48, %v3763_v44  ;;  %v3796_v58 = vrot.slane %v1133_v49, %v3763_v44 }
  0x48   :  { %3282 = vmatprep.mubr.msk.f32.mxu0 %vm72_vm0, %v21_v59  ;;  %3290 = vmatprep.mubr.msk.f32.mxu1 %vm72_vm0, %v37_v60  ;;  %v3799_v59 = vrot.slane %v1347_v50, %v3763_v44  ;;  %v3802_v60 = vrot.slane %v1561_v51, %v3763_v44 }
  0x49   :  { %6126 = vst [vmem:[#allocation15_spill] sm:$0xff] %v3793_v57  ;;  %6127 = vst [vmem:[#allocation16_spill] sm:$0xff] %v3796_v58 }
  0x4a   :  { %6128 = vst [vmem:[#allocation17_spill] sm:$0xff] %v3799_v59  ;;  %6129 = vst [vmem:[#allocation18_spill] sm:$0xff] %v3802_v60 }
  0x4b   :  { %206 = vmatmul.mubr.f32.gmra.mrb[8].mxu0 %v20_v61  ;;  %246 = vmatmul.mubr.f32.gmra.mrb[8].mxu1 %v36_v62 }
  0x4c   :  { %3283 = vmatprep.mubr.msk.f32.mxu0 %vm72_vm0, %v23_v63  ;;  %3291 = vmatprep.mubr.msk.f32.mxu1 %vm72_vm0, %v39_v3  ;;  %v3811_v3 = vrot.slane %v1775_v52, %v3763_v44 }
  0x4e   :  { %6130 = vst [vmem:[#allocation19_spill] sm:$0xff] %v3811_v3 }
  0x4f   :  { %211 = vmatmul.mubr.f32.gmra.mrb[10].mxu0 %v22_v4  ;;  %251 = vmatmul.mubr.f32.gmra.mrb[10].mxu1 %v38_v6  ;;  %v3851_v6 = vrot.slane %v3059_v29, %v3763_v44 }
  0x50   :  { %3284 = vmatprep.mubr.msk.f32.mxu0 %vm72_vm0, %v25_v9  ;;  %3292 = vmatprep.mubr.msk.f32.mxu1 %vm72_vm0, %v41_v12 }
  0x51   :  { %6136 = vst [vmem:[#allocation25_spill] sm:$0xff] %v3851_v6 }
  0x53   :  { %216 = vmatmul.mubr.f32.gmra.mrb[12].mxu0 %v24_v13  ;;  %256 = vmatmul.mubr.f32.gmra.mrb[12].mxu1 %v40_v16  ;;  %v1989_v16 = vrot.slane %v3577_v27, %v3763_v44  ;;  %v499_v13 = vcombine.high %v491_v46, %v491_v46  ;;  %v927_v46 = vcombine.high %v919_v48, %v919_v48 }
  0x54   :  { %3285 = vmatprep.mubr.msk.f32.mxu0 %vm72_vm0, %v27_v17  ;;  %3293 = vmatprep.mubr.msk.f32.mxu1 %vm72_vm0, %v43_v20  ;;  %v2203_v17 = vrot.slane %v3591_v30, %v3763_v44  ;;  %v2417_v20 = vrot.slane %v3605_v33, %v3763_v44  ;;  %v1569_v33 = vcombine.high %v1561_v51, %v1561_v51 }
  0x55   :  { %v3836_v35 = vrot.slane %v1989_v16, %v3763_v44  ;;  %v3863_v62 = vrot.slane %v499_v13, %v3763_v44  ;;  %v1355_v13 = vcombine.high %v1347_v50, %v1347_v50  ;;  %v1783_v30 = vcombine.high %v1775_v52, %v1775_v52 }
  0x56   :  { %v3839_v38 = vrot.slane %v2203_v17, %v3763_v44  ;;  %v3842_v41 = vrot.slane %v2417_v20, %v3763_v44  ;;  %v1997_v27 = vcombine.high %v1989_v16, %v1989_v16  ;;  %v3879_v42 = vrot.slane %v927_v46, %v3763_v44 }
  0x57   :  { %221 = vmatmul.mubr.f32.gmra.mrb[14].mxu0 %v26_v23  ;;  %261 = vmatmul.mubr.f32.gmra.mrb[14].mxu1 %v42_v26  ;;  %v2631_v23 = vrot.slane %v3619_v36, %v3763_v44  ;;  %v2845_v26 = vrot.slane %v3633_v39, %v3763_v44  ;;  %6131 = vst [vmem:[#allocation20_spill] sm:$0xff] %v3836_v35  ;;  %6138 = vst [vmem:[#allocation27_spill] sm:$0xff] %v3863_v62 }
  0x58   :  { %6132 = vst [vmem:[#allocation21_spill] sm:$0xff] %v3839_v38  ;;  %6133 = vst [vmem:[#allocation22_spill] sm:$0xff] %v3842_v41  ;;  %v713_v39 = vcombine.high %v705_v47, %v705_v47  ;;  %v1141_v36 = vcombine.high %v1133_v49, %v1133_v49  ;;  %v2211_v4 = vcombine.high %v2203_v17, %v2203_v17 }
  0x59   :  { %v3845_v12 = vrot.slane %v2631_v23, %v3763_v44  ;;  %v3848_v9 = vrot.slane %v2845_v26, %v3763_v44  ;;  %6140 = vst [vmem:[#allocation29_spill] sm:$0xff] %v3879_v42  ;;  %v3885_v24 = vrot.slane %v1355_v13, %v3763_v44  ;;  %v3888_v47 = vrot.slane %v1569_v33, %v3763_v44 }
  0x5a   :  { %v3876_v61 = vrot.slane %v713_v39, %v3763_v44  ;;  %v3882_v32 = vrot.slane %v1141_v36, %v3763_v44  ;;  %v3891_v48 = vrot.slane %v1783_v30, %v3763_v44  ;;  %v3894_v49 = vrot.slane %v1997_v27, %v3763_v44 }
  0x5b   :  { %6134 = vst [vmem:[#allocation23_spill] sm:$0xff] %v3845_v12  ;;  %6135 = vst [vmem:[#allocation24_spill] sm:$0xff] %v3848_v9  ;;  %v3903_v51 = vrot.slane %v2211_v4, %v3763_v44  ;;  %v2425_v17 = vcombine.high %v2417_v20, %v2417_v20  ;;  %v2639_v46 = vcombine.high %v2631_v23, %v2631_v23 }
  0x5c   :  { %6139 = vst [vmem:[#allocation28_spill] sm:$0xff] %v3876_v61  ;;  %6141 = vst [vmem:[#allocation30_spill] sm:$0xff] %v3882_v32  ;;  %v2853_v13 = vcombine.high %v2845_v26, %v2845_v26  ;;  %v3067_v4 = vcombine.high %v3059_v29, %v3059_v29  ;;  %v315_v50 = vcombine.high %v3782_v53, %v3782_v53 }
  0x5d   :  { %6142 = vst [vmem:[#allocation31_spill] sm:$0xff] %v3885_v24  ;;  %6143 = vst [vmem:[#allocation32_spill] sm:$0xff] %v3888_v47  ;;  %v529_v33 = vcombine.high %v3787_v55, %v3787_v55  ;;  %v743_v30 = vcombine.high %v3790_v56, %v3790_v56  ;;  %v3922_v27 = vrot.slane %v2425_v17, %v3763_v44 }
  0x5e   :  { %6144 = vst [vmem:[#allocation33_spill] sm:$0xff] %v3891_v48  ;;  %6145 = vst [vmem:[#allocation34_spill] sm:$0xff] %v3894_v49  ;;  %v3925_v52 = vrot.slane %v2639_v46, %v3763_v44  ;;  %v3928_v20 = vrot.slane %v2853_v13, %v3763_v44  ;;  %v957_v23 = vcombine.high %v3793_v57, %v3793_v57 }
  0x5f   :  { %6146 = vst [vmem:[#allocation35_spill] sm:$0xff] %v3903_v51  ;;  %6147 = vst [vmem:[#allocation36_spill] sm:$0xff] %v3922_v27  ;;  %v3933_v26 = vrot.slane %v3067_v4, %v3763_v44  ;;  %v3936_v29 = vrot.slane %v315_v50, %v3784_v54  ;;  %v3939_v16 = vrot.slane %v529_v33, %v3784_v54 }
  0x60   :  { %6148 = vst [vmem:[#allocation37_spill] sm:$0xff] %v3925_v52  ;;  %6149 = vst [vmem:[#allocation38_spill] sm:$0xff] %v3928_v20  ;;  %v3942_v17 = vrot.slane %v743_v30, %v3784_v54  ;;  %v3951_v4 = vrot.slane %v957_v23, %v3784_v54  ;;  %v1171_v33 = vcombine.high %v3796_v58, %v3796_v58 }
  0x61   :  { %6150 = vst [vmem:[#allocation39_spill] sm:$0xff] %v3933_v26  ;;  %6151 = vst [vmem:[#allocation40_spill] sm:$0xff] %v3936_v29  ;;  %v1385_v30 = vcombine.high %v3799_v59, %v3799_v59  ;;  %v1599_v46 = vcombine.high %v3802_v60, %v3802_v60  ;;  %v1813_v13 = vcombine.high %v3811_v3, %v3811_v3  ;;  %v6191_v3 = vld [vmem:[#allocation10_spill] sm:$0xff]  ;;  %v6192_v60 = vld [vmem:[#allocation11_spill] sm:$0xff] }
  0x62   :  { %6152 = vst [vmem:[#allocation41_spill] sm:$0xff] %v3939_v16  ;;  %6153 = vst [vmem:[#allocation42_spill] sm:$0xff] %v3942_v17  ;;  %v2027_v36 = vcombine.high %v3836_v35, %v3836_v35  ;;  %v2241_v23 = vcombine.high %v3839_v38, %v3839_v38  ;;  %v2455_v50 = vcombine.high %v3842_v41, %v3842_v41  ;;  %v6190_v35 = vld [vmem:[#allocation9_spill] sm:$0xff] }
  0x63   :  { %6154 = vst [vmem:[#allocation43_spill] sm:$0xff] %v3951_v4  ;;  %v3970_v39 = vrot.slane %v1171_v33, %v3784_v54  ;;  %v3973_v63 = vrot.slane %v1385_v30, %v3784_v54  ;;  %v3976_v4 = vrot.slane %v1599_v46, %v3784_v54  ;;  %v2669_v17 = vcombine.high %v3845_v12, %v3845_v12 }
  0x64   :  { %v3981_v16 = vrot.slane %v1813_v13, %v3784_v54  ;;  %v3984_v29 = vrot.slane %v2027_v36, %v3784_v54  ;;  %v3987_v41 = vrot.slane %v2241_v23, %v3784_v54  ;;  %v3990_v33 = vrot.slane %v2455_v50, %v3784_v54 }
  0x65   :  { %6155 = vst [vmem:[#allocation44_spill] sm:$0xff] %v3970_v39  ;;  %6156 = vst [vmem:[#allocation45_spill] sm:$0xff] %v3973_v63  ;;  %v3993_v30 = vrot.slane %v2669_v17, %v3784_v54  ;;  %v2883_v46 = vcombine.high %v3848_v9, %v3848_v9  ;;  %v317_v13 = vcombine.high %v3854_v45, %v3854_v45 }
  0x66   :  { %6157 = vst [vmem:[#allocation46_spill] sm:$0xff] %v3976_v4  ;;  %6158 = vst [vmem:[#allocation47_spill] sm:$0xff] %v3981_v16  ;;  %v3097_v4 = vcombine.high %v3851_v6, %v3851_v6  ;;  %v531_v36 = vcombine.high %v3863_v62, %v3863_v62  ;;  %v745_v23 = vcombine.high %v3876_v61, %v3876_v61  ;;  %v6189_v6 = vld [vmem:[#allocation8_spill] sm:$0xff] }
  0x67   :  { %6159 = vst [vmem:[#allocation48_spill] sm:$0xff] %v3984_v29  ;;  %6160 = vst [vmem:[#allocation49_spill] sm:$0xff] %v3987_v41  ;;  %v959_v50 = vcombine.high %v3879_v42, %v3879_v42  ;;  %v1173_v17 = vcombine.high %v3882_v32, %v3882_v32  ;;  %v4016_v41 = vrot.slane %v317_v13, %v3784_v54  ;;  %v6185_v42 = vld [vmem:[#allocation6_spill] sm:$0xff] }
  0x68   :  { %6161 = vst [vmem:[#allocation50_spill] sm:$0xff] %v3990_v33  ;;  %6162 = vst [vmem:[#allocation51_spill] sm:$0xff] %v3993_v30  ;;  %v4010_v30 = vrot.slane %v2883_v46, %v3784_v54  ;;  %v4013_v33 = vrot.slane %v3097_v4, %v3784_v54  ;;  %v1387_v29 = vcombine.high %v3885_v24, %v3885_v24  ;;  %v6184_v24 = vld [vmem:[#allocation5_spill] sm:$0xff] }
  0x69   :  { %6165 = vst [vmem:[#allocation54_spill] sm:$0xff] %v4016_v41  ;;  %v4021_v16 = vrot.slane %v531_v36, %v3784_v54  ;;  %v4024_v63 = vrot.slane %v745_v23, %v3784_v54  ;;  %v4027_v39 = vrot.slane %v959_v50, %v3784_v54  ;;  %v4030_v46 = vrot.slane %v1173_v17, %v3784_v54 }
  0x6a   :  { %6163 = vst [vmem:[#allocation52_spill] sm:$0xff] %v4010_v30  ;;  %6164 = vst [vmem:[#allocation53_spill] sm:$0xff] %v4013_v33  ;;  %v4033_v4 = vrot.slane %v1387_v29, %v3784_v54  ;;  %v1601_v13 = vcombine.high %v3888_v47, %v3888_v47  ;;  %v1815_v41 = vcombine.high %v3891_v48, %v3891_v48 }
  0x6b   :  { %6166 = vst [vmem:[#allocation55_spill] sm:$0xff] %v4021_v16  ;;  %6167 = vst [vmem:[#allocation56_spill] sm:$0xff] %v4024_v63  ;;  %v2029_v36 = vcombine.high %v3894_v49, %v3894_v49  ;;  %v2243_v23 = vcombine.high %v3903_v51, %v3903_v51  ;;  %v2457_v50 = vcombine.high %v3922_v27, %v3922_v27 }
  0x6c   :  { %6168 = vst [vmem:[#allocation57_spill] sm:$0xff] %v4027_v39  ;;  %6169 = vst [vmem:[#allocation58_spill] sm:$0xff] %v4030_v46  ;;  %v2671_v17 = vcombine.high %v3925_v52, %v3925_v52  ;;  %v2885_v29 = vcombine.high %v3928_v20, %v3928_v20  ;;  %v4053_v46 = vrot.slane %v1815_v41, %v3784_v54 }
  0x6d   :  { %6170 = vst [vmem:[#allocation59_spill] sm:$0xff] %v4033_v4  ;;  %v4050_v4 = vrot.slane %v1601_v13, %v3784_v54  ;;  %v4056_v39 = vrot.slane %v2029_v36, %v3784_v54  ;;  %v3099_v63 = vcombine.high %v3933_v26, %v3933_v26  ;;  %v4061_v16 = vrot.slane %v2243_v23, %v3784_v54 }
  0x6e   :  { %6172 = vst [vmem:[#allocation61_spill] sm:$0xff] %v4053_v46  ;;  %v4064_v33 = vrot.slane %v2457_v50, %v3784_v54  ;;  %v4067_v30 = vrot.slane %v2671_v17, %v3784_v54  ;;  %v4070_v13 = vrot.slane %v2885_v29, %v3784_v54  ;;  %v4077_v36 = vrot.slane %v3463_v1, %v3763_v44 }
  0x6f   :  { %6171 = vst [vmem:[#allocation60_spill] sm:$0xff] %v4050_v4  ;;  %6173 = vst [vmem:[#allocation62_spill] sm:$0xff] %v4056_v39  ;;  %v4073_v41 = vrot.slane %v3099_v63, %v3784_v54  ;;  %v4081_v23 = vrot.slane %v3476_v5, %v3763_v44  ;;  %v4085_v50 = vrot.slane %v3490_v8, %v3763_v44 }
  0x70   :  { %6174 = vst [vmem:[#allocation63_spill] sm:$0xff] %v4061_v16  ;;  %6175 = vst [vmem:[#allocation64_spill] sm:$0xff] %v4064_v33  ;;  %v4089_v17 = vrot.slane %v3504_v11, %v3763_v44  ;;  %v4093_v63 = vrot.slane %v3522_v15, %v3763_v44  ;;  %v4097_v1 = vrot.slane %v3540_v19, %v3763_v44 }
  0x71   :  { %6176 = vst [vmem:[#allocation65_spill] sm:$0xff] %v4067_v30  ;;  %6177 = vst [vmem:[#allocation66_spill] sm:$0xff] %v4070_v13  ;;  %v4101_v5 = vrot.slane %v3554_v22, %v3763_v44  ;;  %v4105_v8 = vrot.slane %v4077_v36, %v3763_v44  ;;  %v4109_v11 = vrot.slane %v4081_v23, %v3763_v44 }
  0x72   :  { %6178 = vst [vmem:[#allocation67_spill] sm:$0xff] %v4073_v41  ;;  %v4113_v15 = vrot.slane %v4085_v50, %v3763_v44  ;;  %v4117_v19 = vrot.slane %v3568_v25, %v3763_v44  ;;  %v4121_v22 = vrot.slane %v4089_v17, %v3763_v44  ;;  %v4125_v29 = vrot.slane %v4093_v63, %v3763_v44 }
  0x73   :  { %6179 = vst [vmem:[#allocation68_spill] sm:$0xff] %v4105_v8  ;;  %6180 = vst [vmem:[#allocation69_spill] sm:$0xff] %v4109_v11  ;;  %v4129_v41 = vrot.slane %v4097_v1, %v3763_v44  ;;  %v4133_v13 = vrot.slane %v4101_v5, %v3763_v44  ;;  %v4157_v33 = vrot.slane %v3582_v28, %v3763_v44 }
  0x74   :  { %6181 = vst [vmem:[#allocation70_spill] sm:$0xff] %v4113_v15  ;;  %6182 = vst [vmem:[#allocation71_spill] sm:$0xff] %v4121_v22  ;;  %v4143_v16 = vrot.slane %v4117_v19, %v3763_v44  ;;  %v4161_v26 = vrot.slane %v3596_v31, %v3763_v44  ;;  %v4165_v46 = vrot.slane %v3610_v34, %v3763_v44 }
  0x75   :  { %6183 = vst [vmem:[#allocation72_spill] sm:$0xff] %v4125_v29  ;;  %v4169_v4 = vrot.slane %v3624_v37, %v3763_v44  ;;  %v4173_v25 = vrot.slane %v3638_v40, %v3763_v44  ;;  %v4177_v28 = vrot.slane %v3652_v43, %v3763_v44  ;;  %v270_v31 = vcombine.high %v3458_v0, %v3458_v0 }
  0x76   :  { %v4183_v30 = vrot.slane %v4157_v33, %v3763_v44  ;;  %v4187_v34 = vrot.slane %v4161_v26, %v3763_v44  ;;  %v4191_v37 = vrot.slane %v4165_v46, %v3763_v44  ;;  %v484_v40 = vcombine.high %v3468_v2, %v3468_v2 }
  0x77   :  { %v4197_v43 = vrot.slane %v4169_v4, %v3763_v44  ;;  %v4201_v0 = vrot.slane %v4173_v25, %v3763_v44  ;;  %v4205_v39 = vrot.slane %v4177_v28, %v3763_v44  ;;  %v4208_v20 = vrot.slane %v270_v31, %v3763_v44 }
  0x78   :  { %v4217_v51 = vrot.slane %v484_v40, %v3763_v44  ;;  %v698_v40 = vcombine.high %v3485_v7, %v3485_v7  ;;  %v912_v49 = vcombine.high %v3499_v10, %v3499_v10  ;;  %v1126_v48 = vcombine.high %v3517_v14, %v3517_v14 }
  0x79   :  { %v4227_v52 = vrot.slane %v4208_v20, %v3763_v44  ;;  %v1340_v27 = vcombine.high %v3535_v18, %v3535_v18  ;;  %v1554_v47 = vcombine.high %v3549_v21, %v3549_v21  ;;  %v1768_v32 = vcombine.high %v6184_v24, %v6184_v24 }
  0x7a   :  { %v4231_v2 = vrot.slane %v4217_v51, %v3763_v44  ;;  %v4250_v10 = vrot.slane %v698_v40, %v3763_v44  ;;  %v4253_v14 = vrot.slane %v912_v49, %v3763_v44  ;;  %v4256_v31 = vrot.slane %v1126_v48, %v3763_v44 }
  0x7b   :  { %v4259_v18 = vrot.slane %v1340_v27, %v3763_v44  ;;  %v4262_v21 = vrot.slane %v1554_v47, %v3763_v44  ;;  %v4265_v24 = vrot.slane %v1768_v32, %v3763_v44  ;;  %v1982_v7 = vcombine.high %v6185_v42, %v6185_v42  ;;  %v6186_v47 = vld [vmem:[#allocation7_spill] sm:$0xff] }
  0x7c   :  { %v4271_v40 = vrot.slane %v4250_v10, %v3763_v44  ;;  %v4275_v48 = vrot.slane %v4253_v14, %v3763_v44  ;;  %v4279_v49 = vrot.slane %v4256_v31, %v3763_v44  ;;  %v2196_v27 = vcombine.high %v6186_v47, %v6186_v47 }
  0x7d   :  { %v4285_v32 = vrot.slane %v4259_v18, %v3763_v44  ;;  %v4289_v42 = vrot.slane %v4262_v21, %v3763_v44  ;;  %v4293_v61 = vrot.slane %v4265_v24, %v3763_v44  ;;  %v4296_v62 = vrot.slane %v1982_v7, %v3763_v44 }
  0x7e   :  { %v4305_v9 = vrot.slane %v2196_v27, %v3763_v44  ;;  %v2410_v27 = vcombine.high %v6189_v6, %v6189_v6  ;;  %v2624_v12 = vcombine.high %v6190_v35, %v6190_v35  ;;  %v2838_v38 = vcombine.high %v6191_v3, %v6191_v3 }
  0x7f   :  { %v4315_v45 = vrot.slane %v4296_v62, %v3763_v44  ;;  %v3052_v59 = vcombine.high %v6192_v60, %v6192_v60  ;;  %v334_v58 = vcombine.high %v4077_v36, %v4077_v36  ;;  %v548_v57 = vcombine.high %v4081_v23, %v4081_v23 }
  0x80   :  { %v4319_v47 = vrot.slane %v4305_v9, %v3763_v44  ;;  %v4338_v35 = vrot.slane %v2410_v27, %v3763_v44  ;;  %v4341_v3 = vrot.slane %v2624_v12, %v3763_v44  ;;  %v4344_v7 = vrot.slane %v2838_v38, %v3763_v44 }
  0x81   :  { %6187 = vst [vmem:[#allocation5_spill] sm:$0xff] %v4315_v45  ;;  %v4347_v60 = vrot.slane %v3052_v59, %v3763_v44  ;;  %v4350_v36 = vrot.slane %v334_v58, %v3763_v44  ;;  %v4353_v23 = vrot.slane %v548_v57, %v3763_v44  ;;  %v762_v6 = vcombine.high %v4085_v50, %v4085_v50 }
  0x82   :  { %6188 = vst [vmem:[#allocation6_spill] sm:$0xff] %v4319_v47  ;;  %v4359_v27 = vrot.slane %v4338_v35, %v3763_v44  ;;  %v4363_v12 = vrot.slane %v4341_v3, %v3763_v44  ;;  %v4367_v59 = vrot.slane %v4344_v7, %v3763_v44  ;;  %v976_v58 = vcombine.high %v4089_v17, %v4089_v17 }
  0x83   :  { %6193 = vst [vmem:[#allocation7_spill] sm:$0xff] %v4350_v36  ;;  %6194 = vst [vmem:[#allocation8_spill] sm:$0xff] %v4353_v23  ;;  %v4373_v57 = vrot.slane %v4347_v60, %v3763_v44  ;;  %v4380_v56 = vrot.slane %v762_v6, %v3763_v44  ;;  %v1190_v6 = vcombine.high %v4093_v63, %v4093_v63 }
  0x84   :  { %6195 = vst [vmem:[#allocation9_spill] sm:$0xff] %v4367_v59  ;;  %v4389_v47 = vrot.slane %v976_v58, %v3763_v44  ;;  %v1404_v55 = vcombine.high %v4097_v1, %v4097_v1  ;;  %v1618_v17 = vcombine.high %v4101_v5, %v4101_v5  ;;  %v1832_v58 = vcombine.high %v4117_v19, %v4117_v19 }
  0x85   :  { %6196 = vst [vmem:[#allocation10_spill] sm:$0xff] %v4373_v57  ;;  %6197 = vst [vmem:[#allocation11_spill] sm:$0xff] %v4380_v56  ;;  %v2046_v38 = vcombine.high %v4157_v33, %v4157_v33  ;;  %v4408_v50 = vrot.slane %v1190_v6, %v3763_v44  ;;  %v2260_v1 = vcombine.high %v4161_v26, %v4161_v26 }
  0x86   :  { %6198 = vst [vmem:[#allocation73_spill] sm:$0xff] %v4389_v47  ;;  %v4411_v63 = vrot.slane %v1404_v55, %v3763_v44  ;;  %v2474_v53 = vcombine.high %v4165_v46, %v4165_v46  ;;  %v4418_v5 = vrot.slane %v1618_v17, %v3763_v44  ;;  %v4421_v19 = vrot.slane %v1832_v58, %v3763_v44 }
  0x87   :  { %6199 = vst [vmem:[#allocation74_spill] sm:$0xff] %v4408_v50  ;;  %v4424_v33 = vrot.slane %v2046_v38, %v3763_v44  ;;  %v2688_v6 = vcombine.high %v4169_v4, %v4169_v4  ;;  %v4433_v46 = vrot.slane %v2260_v1, %v3763_v44  ;;  %v3116_v58 = vcombine.high %v4177_v28, %v4177_v28 }
  0x88   :  { %6200 = vst [vmem:[#allocation75_spill] sm:$0xff] %v4411_v63  ;;  %6201 = vst [vmem:[#allocation76_spill] sm:$0xff] %v4418_v5  ;;  %v4436_v17 = vrot.slane %v2474_v53, %v3763_v44  ;;  %v2902_v53 = vcombine.high %v4173_v25, %v4173_v25  ;;  %v286_v4 = vcombine.high %v4208_v20, %v4208_v20 }
  0x89   :  { %6202 = vst [vmem:[#allocation77_spill] sm:$0xff] %v4421_v19  ;;  %6203 = vst [vmem:[#allocation78_spill] sm:$0xff] %v4424_v33  ;;  %v4445_v55 = vrot.slane %v2688_v6, %v3763_v44  ;;  %v500_v6 = vcombine.high %v4217_v51, %v4217_v51  ;;  %v714_v26 = vcombine.high %v4250_v10, %v4250_v10 }
  0x8a   :  { %6204 = vst [vmem:[#allocation79_spill] sm:$0xff] %v4433_v46  ;;  %6205 = vst [vmem:[#allocation80_spill] sm:$0xff] %v4436_v17  ;;  %v4464_v1 = vrot.slane %v2902_v53, %v3763_v44  ;;  %v4467_v25 = vrot.slane %v3116_v58, %v3763_v44  ;;  %v928_v28 = vcombine.high %v4253_v14, %v4253_v14 }
  0x8b   :  { %6206 = vst [vmem:[#allocation81_spill] sm:$0xff] %v4445_v55  ;;  %v1142_v38 = vcombine.high %v4256_v31, %v4256_v31  ;;  %v4474_v20 = vrot.slane %v286_v4, %v3763_v44  ;;  %v4477_v51 = vrot.slane %v500_v6, %v3763_v44  ;;  %v4480_v10 = vrot.slane %v714_v26, %v3763_v44 }
  0x8c   :  { %6207 = vst [vmem:[#allocation82_spill] sm:$0xff] %v4464_v1  ;;  %6208 = vst [vmem:[#allocation83_spill] sm:$0xff] %v4467_v25  ;;  %v1356_v53 = vcombine.high %v4259_v18, %v4259_v18  ;;  %v4489_v31 = vrot.slane %v928_v28, %v3763_v44  ;;  %v1784_v6 = vcombine.high %v4265_v24, %v4265_v24 }
  0x8d   :  { %6209 = vst [vmem:[#allocation84_spill] sm:$0xff] %v4474_v20  ;;  %6210 = vst [vmem:[#allocation85_spill] sm:$0xff] %v4477_v51  ;;  %v4492_v4 = vrot.slane %v1142_v38, %v3763_v44  ;;  %v1570_v38 = vcombine.high %v4262_v21, %v4262_v21  ;;  %v1998_v18 = vcombine.high %v4296_v62, %v4296_v62 }
  0x8e   :  { %6211 = vst [vmem:[#allocation86_spill] sm:$0xff] %v4480_v10  ;;  %6212 = vst [vmem:[#allocation87_spill] sm:$0xff] %v4489_v31  ;;  %v4501_v58 = vrot.slane %v1356_v53, %v3763_v44  ;;  %v2212_v53 = vcombine.high %v4305_v9, %v4305_v9  ;;  %v2426_v14 = vcombine.high %v4338_v35, %v4338_v35 }
  0x8f   :  { %6213 = vst [vmem:[#allocation88_spill] sm:$0xff] %v4492_v4  ;;  %v4520_v28 = vrot.slane %v1570_v38, %v3763_v44  ;;  %v4523_v21 = vrot.slane %v1784_v6, %v3763_v44  ;;  %v2640_v24 = vcombine.high %v4341_v3, %v4341_v3  ;;  %v2854_v26 = vcombine.high %v4344_v7, %v4344_v7 }
  0x90   :  { %6214 = vst [vmem:[#allocation89_spill] sm:$0xff] %v4501_v58  ;;  %v4530_v62 = vrot.slane %v1998_v18, %v3763_v44  ;;  %v4533_v9 = vrot.slane %v2212_v53, %v3763_v44  ;;  %v4536_v35 = vrot.slane %v2426_v14, %v3763_v44  ;;  %v3068_v38 = vcombine.high %v4347_v60, %v4347_v60 }
  0x91   :  { %6215 = vst [vmem:[#allocation90_spill] sm:$0xff] %v4520_v28  ;;  %6216 = vst [vmem:[#allocation91_spill] sm:$0xff] %v4523_v21  ;;  %v4545_v7 = vrot.slane %v2640_v24, %v3763_v44  ;;  %v4548_v18 = vrot.slane %v2854_v26, %v3763_v44  ;;  %v364_v26 = vcombine.high %v4105_v8, %v4105_v8 }
  0x92   :  { %6217 = vst [vmem:[#allocation92_spill] sm:$0xff] %v4530_v62  ;;  %6218 = vst [vmem:[#allocation93_spill] sm:$0xff] %v4533_v9  ;;  %v4557_v6 = vrot.slane %v3068_v38, %v3763_v44  ;;  %v578_v53 = vcombine.high %v4109_v11, %v4109_v11  ;;  %v792_v60 = vcombine.high %v4113_v15, %v4113_v15 }
  0x93   :  { %6219 = vst [vmem:[#allocation94_spill] sm:$0xff] %v4536_v35  ;;  %6220 = vst [vmem:[#allocation95_spill] sm:$0xff] %v4545_v7  ;;  %v1006_v38 = vcombine.high %v4121_v22, %v4121_v22  ;;  %v1220_v3 = vcombine.high %v4125_v29, %v4125_v29  ;;  %v4576_v24 = vrot.slane %v364_v26, %v3784_v54 }
  0x94   :  { %6221 = vst [vmem:[#allocation96_spill] sm:$0xff] %v4548_v18  ;;  %6222 = vst [vmem:[#allocation97_spill] sm:$0xff] %v4557_v6  ;;  %v4579_v8 = vrot.slane %v578_v53, %v3784_v54  ;;  %v1434_v11 = vcombine.high %v4129_v41, %v4129_v41  ;;  %v1648_v14 = vcombine.high %v4133_v13, %v4133_v13 }
  0x95   :  { %6223 = vst [vmem:[#allocation98_spill] sm:$0xff] %v4576_v24  ;;  %v4586_v15 = vrot.slane %v792_v60, %v3784_v54  ;;  %v4589_v22 = vrot.slane %v1006_v38, %v3784_v54  ;;  %v4592_v29 = vrot.slane %v1220_v3, %v3784_v54  ;;  %v1862_v26 = vcombine.high %v4143_v16, %v4143_v16 }
  0x96   :  { %6224 = vst [vmem:[#allocation99_spill] sm:$0xff] %v4579_v8  ;;  %v4597_v53 = vrot.slane %v1434_v11, %v3784_v54  ;;  %v4600_v8 = vrot.slane %v1648_v14, %v3784_v54  ;;  %v2076_v24 = vcombine.high %v4183_v30, %v4183_v30  ;;  %v2290_v60 = vcombine.high %v4187_v34, %v4187_v34 }
  0x97   :  { %6225 = vst [vmem:[#allocation100_spill] sm:$0xff] %v4586_v15  ;;  %6226 = vst [vmem:[#allocation101_spill] sm:$0xff] %v4589_v22  ;;  %v4607_v38 = vrot.slane %v1862_v26, %v3784_v54  ;;  %v2504_v3 = vcombine.high %v4191_v37, %v4191_v37  ;;  %v2932_v11 = vcombine.high %v4201_v0, %v4201_v0 }
  0x98   :  { %6227 = vst [vmem:[#allocation102_spill] sm:$0xff] %v4592_v29  ;;  %6228 = vst [vmem:[#allocation103_spill] sm:$0xff] %v4597_v53  ;;  %v2718_v29 = vcombine.high %v4197_v43, %v4197_v43  ;;  %v4616_v14 = vrot.slane %v2076_v24, %v3784_v54  ;;  %v3146_v53 = vcombine.high %v4205_v39, %v4205_v39 }
  0x99   :  { %6229 = vst [vmem:[#allocation104_spill] sm:$0xff] %v4600_v8  ;;  %6230 = vst [vmem:[#allocation105_spill] sm:$0xff] %v4607_v38  ;;  %v4619_v8 = vrot.slane %v2290_v60, %v3784_v54  ;;  %v316_v26 = vcombine.high %v4227_v52, %v4227_v52  ;;  %v4626_v38 = vrot.slane %v2504_v3, %v3784_v54 }
  0x9a   :  { %6231 = vst [vmem:[#allocation106_spill] sm:$0xff] %v4616_v14  ;;  %v4629_v22 = vrot.slane %v2718_v29, %v3784_v54  ;;  %v4632_v15 = vrot.slane %v2932_v11, %v3784_v54  ;;  %v530_v24 = vcombine.high %v4231_v2, %v4231_v2  ;;  %v4637_v60 = vrot.slane %v3146_v53, %v3784_v54 }
  0x9b   :  { %6232 = vst [vmem:[#allocation107_spill] sm:$0xff] %v4619_v8  ;;  %6233 = vst [vmem:[#allocation108_spill] sm:$0xff] %v4626_v38  ;;  %v4640_v8 = vrot.slane %v316_v26, %v3784_v54  ;;  %v744_v14 = vcombine.high %v4271_v40, %v4271_v40  ;;  %v958_v3 = vcombine.high %v4275_v48, %v4275_v48 }
  0x9c   :  { %6234 = vst [vmem:[#allocation109_spill] sm:$0xff] %v4629_v22  ;;  %6235 = vst [vmem:[#allocation110_spill] sm:$0xff] %v4632_v15  ;;  %v4647_v29 = vrot.slane %v530_v24, %v3784_v54  ;;  %v1172_v11 = vcombine.high %v4279_v49, %v4279_v49  ;;  %v1386_v15 = vcombine.high %v4285_v32, %v4285_v32 }
  0x9d   :  { %6236 = vst [vmem:[#allocation111_spill] sm:$0xff] %v4637_v60  ;;  %6237 = vst [vmem:[#allocation112_spill] sm:$0xff] %v4640_v8  ;;  %v1600_v53 = vcombine.high %v4289_v42, %v4289_v42  ;;  %v4656_v26 = vrot.slane %v744_v14, %v3784_v54  ;;  %v4659_v8 = vrot.slane %v958_v3, %v3784_v54  ;;  %v6244_v14 = vld [vmem:[#allocation6_spill] sm:$0xff] }
  0x9e   :  { %6238 = vst [vmem:[#allocation113_spill] sm:$0xff] %v4647_v29  ;;  %v1814_v60 = vcombine.high %v4293_v61, %v4293_v61  ;;  %v2028_v24 = vcombine.high %v4315_v45, %v4315_v45  ;;  %v4666_v29 = vrot.slane %v1172_v11, %v3784_v54  ;;  %v4669_v22 = vrot.slane %v1386_v15, %v3784_v54 }
  0x9f   :  { %6239 = vst [vmem:[#allocation114_spill] sm:$0xff] %v4656_v26  ;;  %6240 = vst [vmem:[#allocation115_spill] sm:$0xff] %v4659_v8  ;;  %v4672_v38 = vrot.slane %v1600_v53, %v3784_v54  ;;  %v2242_v26 = vcombine.high %v6244_v14, %v6244_v14  ;;  %v2456_v45 = vcombine.high %v4359_v27, %v4359_v27 }
  0xa0   :  { %6241 = vst [vmem:[#allocation116_spill] sm:$0xff] %v4666_v29  ;;  %6242 = vst [vmem:[#allocation117_spill] sm:$0xff] %v4669_v22  ;;  %v4677_v3 = vrot.slane %v1814_v60, %v3784_v54  ;;  %v4680_v8 = vrot.slane %v2028_v24, %v3784_v54  ;;  %v2670_v11 = vcombine.high %v4363_v12, %v4363_v12 }
  0xa1   :  { %6243 = vst [vmem:[#allocation118_spill] sm:$0xff] %v4672_v38  ;;  %v4687_v15 = vrot.slane %v2242_v26, %v3784_v54  ;;  %v2884_v53 = vcombine.high %v4367_v59, %v4367_v59  ;;  %v3098_v38 = vcombine.high %v4373_v57, %v4373_v57  ;;  %v366_v60 = vcombine.high %v4350_v36, %v4350_v36  ;;  %v6381_v57 = vld [vmem:[#allocation45_spill] sm:$0xff] }
  0xa2   :  { %6245 = vst [vmem:[#allocation6_spill] sm:$0xff] %v4677_v3  ;;  %6246 = vst [vmem:[#allocation119_spill] sm:$0xff] %v4680_v8  ;;  %v4696_v24 = vrot.slane %v2456_v45, %v3784_v54  ;;  %v4699_v8 = vrot.slane %v2670_v11, %v3784_v54  ;;  %v580_v3 = vcombine.high %v4353_v23, %v4353_v23  ;;  %v6389_v59 = vld [vmem:[#allocation53_spill] sm:$0xff] }
  0xa3   :  { %6247 = vst [vmem:[#allocation120_spill] sm:$0xff] %v4687_v15  ;;  %v794_v26 = vcombine.high %v4380_v56, %v4380_v56  ;;  %v4706_v15 = vrot.slane %v2884_v53, %v3784_v54  ;;  %v4709_v22 = vrot.slane %v3098_v38, %v3784_v54  ;;  %v4712_v29 = vrot.slane %v366_v60, %v3784_v54 }
  0xa4   :  { %6248 = vst [vmem:[#allocation121_spill] sm:$0xff] %v4696_v24  ;;  %6249 = vst [vmem:[#allocation122_spill] sm:$0xff] %v4699_v8  ;;  %v1008_v45 = vcombine.high %v4389_v47, %v4389_v47  ;;  %v4717_v11 = vrot.slane %v580_v3, %v3784_v54  ;;  %v1222_v24 = vcombine.high %v4408_v50, %v4408_v50 }
  0xa5   :  { %6250 = vst [vmem:[#allocation123_spill] sm:$0xff] %v4706_v15  ;;  %6251 = vst [vmem:[#allocation124_spill] sm:$0xff] %v4709_v22  ;;  %v4720_v8 = vrot.slane %v794_v26, %v3784_v54  ;;  %v1436_v53 = vcombine.high %v4411_v63, %v4411_v63  ;;  %v1650_v60 = vcombine.high %v4418_v5, %v4418_v5 }
  0xa6   :  { %6252 = vst [vmem:[#allocation125_spill] sm:$0xff] %v4712_v29  ;;  %6253 = vst [vmem:[#allocation126_spill] sm:$0xff] %v4717_v11  ;;  %v4727_v38 = vrot.slane %v1008_v45, %v3784_v54  ;;  %v1864_v29 = vcombine.high %v4421_v19, %v4421_v19  ;;  %v2078_v3 = vcombine.high %v4424_v33, %v4424_v33 }
  0xa7   :  { %6254 = vst [vmem:[#allocation127_spill] sm:$0xff] %v4720_v8  ;;  %v4736_v26 = vrot.slane %v1222_v24, %v3784_v54  ;;  %v4739_v8 = vrot.slane %v1436_v53, %v3784_v54  ;;  %v2292_v11 = vcombine.high %v4433_v46, %v4433_v46  ;;  %v2506_v45 = vcombine.high %v4436_v17, %v4436_v17  ;;  %v6354_v46 = vld [vmem:[#allocation30_spill] sm:$0xff] }
  0xa8   :  { %6255 = vst [vmem:[#allocation128_spill] sm:$0xff] %v4727_v38  ;;  %v4746_v38 = vrot.slane %v1650_v60, %v3784_v54  ;;  %v4749_v22 = vrot.slane %v1864_v29, %v3784_v54  ;;  %v4752_v15 = vrot.slane %v2078_v3, %v3784_v54  ;;  %v2720_v24 = vcombine.high %v4445_v55, %v4445_v55 }
  0xa9   :  { %6256 = vst [vmem:[#allocation129_spill] sm:$0xff] %v4736_v26  ;;  %6257 = vst [vmem:[#allocation130_spill] sm:$0xff] %v4739_v8  ;;  %v4757_v53 = vrot.slane %v2292_v11, %v3784_v54  ;;  %v4760_v8 = vrot.slane %v2506_v45, %v3784_v54  ;;  %v2934_v26 = vcombine.high %v4464_v1, %v4464_v1 }
  0xaa   :  { %6258 = vst [vmem:[#allocation131_spill] sm:$0xff] %v4746_v38  ;;  %6259 = vst [vmem:[#allocation132_spill] sm:$0xff] %v4749_v22  ;;  %v3148_v60 = vcombine.high %v4467_v25, %v4467_v25  ;;  %v4767_v29 = vrot.slane %v2720_v24, %v3784_v54  ;;  %v318_v3 = vcombine.high %v4474_v20, %v4474_v20 }
  0xab   :  { %6260 = vst [vmem:[#allocation133_spill] sm:$0xff] %v4752_v15  ;;  %6261 = vst [vmem:[#allocation134_spill] sm:$0xff] %v4757_v53  ;;  %v532_v15 = vcombine.high %v4477_v51, %v4477_v51  ;;  %v746_v11 = vcombine.high %v4480_v10, %v4480_v10  ;;  %v4776_v45 = vrot.slane %v2934_v26, %v3784_v54 }
  0xac   :  { %6262 = vst [vmem:[#allocation135_spill] sm:$0xff] %v4760_v8  ;;  %6263 = vst [vmem:[#allocation136_spill] sm:$0xff] %v4767_v29  ;;  %v4779_v8 = vrot.slane %v3148_v60, %v3784_v54  ;;  %v960_v53 = vcombine.high %v4489_v31, %v4489_v31  ;;  %v1174_v24 = vcombine.high %v4492_v4, %v4492_v4  ;;  %v3405_v4 = vld [vmem:[%s5986_s1 + $0x88] sm:$0xff] }
  0xad   :  { %6264 = vst [vmem:[#allocation137_spill] sm:$0xff] %v4776_v45  ;;  %v4786_v29 = vrot.slane %v318_v3, %v3784_v54  ;;  %v4789_v22 = vrot.slane %v532_v15, %v3784_v54  ;;  %v4792_v38 = vrot.slane %v746_v11, %v3784_v54  ;;  %v1388_v26 = vcombine.high %v4501_v58, %v4501_v58  ;;  %v3408_v58 = vld [vmem:[%s5986_s1 + $0xb8] sm:$0xff] }
  0xae   :  { %6265 = vst [vmem:[#allocation138_spill] sm:$0xff] %v4779_v8  ;;  %v4797_v60 = vrot.slane %v960_v53, %v3784_v54  ;;  %v4800_v8 = vrot.slane %v1174_v24, %v3784_v54  ;;  %v1602_v45 = vcombine.high %v4520_v28, %v4520_v28  ;;  %v1816_v3 = vcombine.high %v4523_v21, %v4523_v21 }
  0xaf   :  { %6266 = vst [vmem:[#allocation139_spill] sm:$0xff] %v4786_v29  ;;  %6267 = vst [vmem:[#allocation140_spill] sm:$0xff] %v4789_v22  ;;  %v4807_v15 = vrot.slane %v1388_v26, %v3784_v54  ;;  %v2030_v11 = vcombine.high %v4530_v62, %v4530_v62  ;;  %v2458_v53 = vcombine.high %v4536_v35, %v4536_v35 }
  0xb0   :  { %6268 = vst [vmem:[#allocation141_spill] sm:$0xff] %v4792_v38  ;;  %6269 = vst [vmem:[#allocation142_spill] sm:$0xff] %v4797_v60  ;;  %v2244_v38 = vcombine.high %v4533_v9, %v4533_v9  ;;  %v4816_v24 = vrot.slane %v1602_v45, %v3784_v54  ;;  %v2672_v60 = vcombine.high %v4545_v7, %v4545_v7 }
  0xb1   :  { %6270 = vst [vmem:[#allocation143_spill] sm:$0xff] %v4800_v8  ;;  %6271 = vst [vmem:[#allocation144_spill] sm:$0xff] %v4807_v15  ;;  %v4819_v8 = vrot.slane %v1816_v3, %v3784_v54  ;;  %v2886_v26 = vcombine.high %v4548_v18, %v4548_v18  ;;  %v4826_v15 = vrot.slane %v2030_v11, %v3784_v54  ;;  %v3397_v11 = vld [vmem:[%s5986_s1 + $0x8] sm:$0xff] }
  0xb2   :  { %6272 = vst [vmem:[#allocation145_spill] sm:$0xff] %v4816_v24  ;;  %v4829_v22 = vrot.slane %v2244_v38, %v3784_v54  ;;  %v4832_v29 = vrot.slane %v2458_v53, %v3784_v54  ;;  %v3100_v45 = vcombine.high %v4557_v6, %v4557_v6  ;;  %v4837_v3 = vrot.slane %v2672_v60, %v3784_v54  ;;  %v3398_v38 = vld [vmem:[%s5986_s1 + $0x18] sm:$0xff]  ;;  %v3399_v60 = vld [vmem:[%s5986_s1 + $0x28] sm:$0xff] }
  0xb3   :  { %6273 = vst [vmem:[#allocation146_spill] sm:$0xff] %v4819_v8  ;;  %6274 = vst [vmem:[#allocation147_spill] sm:$0xff] %v4826_v15  ;;  %v4840_v8 = vrot.slane %v2886_v26, %v3784_v54  ;;  %v319_v15 = vcombine.high %v3397_v11, %v3397_v11  ;;  %v533_v53 = vcombine.high %v3398_v38, %v3398_v38  ;;  %v3400_v26 = vld [vmem:[%s5986_s1 + $0x38] sm:$0xff]  ;;  %v3401_v11 = vld [vmem:[%s5986_s1 + $0x48] sm:$0xff] }
  0xb4   :  { %6275 = vst [vmem:[#allocation148_spill] sm:$0xff] %v4829_v22  ;;  %6276 = vst [vmem:[#allocation149_spill] sm:$0xff] %v4832_v29  ;;  %v4849_v29 = vrot.slane %v3100_v45, %v3784_v54  ;;  %v1175_v22 = vcombine.high %v3401_v11, %v3401_v11  ;;  %v2031_v21 = vcombine.high %v3405_v4, %v3405_v4  ;;  %v3409_v4 = vld [vmem:[%s5986_s1 + $0xc8] sm:$0xff] }
  0xb5   :  { %6277 = vst [vmem:[#allocation150_spill] sm:$0xff] %v4837_v3  ;;  %6278 = vst [vmem:[#allocation151_spill] sm:$0xff] %v4840_v8  ;;  %v747_v3 = vcombine.high %v3399_v60, %v3399_v60  ;;  %v961_v8 = vcombine.high %v3400_v26, %v3400_v26  ;;  %v333_v38 = vrot.slane %v319_v15, %v3763_v44  ;;  %v3403_v60 = vld [vmem:[%s5986_s1 + $0x68] sm:$0xff] }
  0xb6   :  { %6279 = vst [vmem:[#allocation152_spill] sm:$0xff] %v4849_v29  ;;  %v547_v45 = vrot.slane %v533_v53, %v3763_v44  ;;  %v3402_v29 = vld [vmem:[%s5986_s1 + $0x58] sm:$0xff]  ;;  %v1603_v6 = vcombine.high %v3403_v60, %v3403_v60  ;;  %v4875_v15 = vrot.slane %v1175_v22, %v3763_v44  ;;  %v6355_v33 = vrot.slane %v6354_v46, %v3784_v54 }
  0xb7   :  { %v1389_v24 = vcombine.high %v3402_v29, %v3402_v29  ;;  %v4869_v26 = vrot.slane %v747_v3, %v3763_v44  ;;  %v4872_v18 = vrot.slane %v961_v8, %v3763_v44  ;;  %v3404_v53 = vld [vmem:[%s5986_s1 + $0x78] sm:$0xff]  ;;  %v4881_v29 = vrot.slane %v333_v38, %v3763_v44 }
  0xb8   :  { %v1817_v11 = vcombine.high %v3404_v53, %v3404_v53  ;;  %v4884_v7 = vrot.slane %v547_v45, %v3763_v44  ;;  %v4890_v8 = vrot.slane %v1603_v6, %v3763_v44  ;;  %v4902_v53 = vrot.slane %v4875_v15, %v3763_v44  ;;  %v3407_v6 = vld [vmem:[%s5986_s1 + $0xa8] sm:$0xff] }
  0xb9   :  { %6280 = vst [vmem:[#allocation153_spill] sm:$0xff] %v4881_v29  ;;  %v4887_v3 = vrot.slane %v1389_v24, %v3763_v44  ;;  %v4894_v22 = vrot.slane %v4869_v26, %v3763_v44  ;;  %v4898_v60 = vrot.slane %v4872_v18, %v3763_v44  ;;  %v3410_v24 = vld [vmem:[%s5986_s1 + $0xd8] sm:$0xff]  ;;  %v549_v25 = vcombine.high %v547_v45, %v547_v45 }
  0xba   :  { %6281 = vst [vmem:[#allocation154_spill] sm:$0xff] %v4884_v7  ;;  %6284 = vst [vmem:[#allocation157_spill] sm:$0xff] %v4902_v53  ;;  %v1831_v35 = vrot.slane %v1817_v11, %v3763_v44  ;;  %v4915_v62 = vrot.slane %v4890_v8, %v3763_v44  ;;  %v3406_v11 = vld [vmem:[%s5986_s1 + $0x98] sm:$0xff]  ;;  %v2887_v53 = vcombine.high %v3409_v4, %v3409_v4  ;;  %s3437_s1 = smov [#allocation2]  }
  0xbb   :  { %6282 = vst [vmem:[#allocation155_spill] sm:$0xff] %v4894_v22  ;;  %6283 = vst [vmem:[#allocation156_spill] sm:$0xff] %v4898_v60  ;;  %v4911_v9 = vrot.slane %v4887_v3, %v3763_v44  ;;  %v2245_v31 = vcombine.high %v3406_v11, %v3406_v11  ;;  %v2045_v11 = vrot.slane %v2031_v21, %v3763_v44  ;;  %s3267_s16 = sshll.u32 %s3437_s1, 4  ;;  %s3268_s16 = int_to_ptr.vmem [resolvable:$true] %s3267_s16 }
  0xbc   :  { %6286 = vst [vmem:[#allocation159_spill] sm:$0xff] %v4915_v62  ;;  %v4924_v28 = vrot.slane %v1831_v35, %v3763_v44  ;;  %v2673_v62 = vcombine.high %v3408_v58, %v3408_v58  ;;  %v2901_v58 = vrot.slane %v2887_v53, %v3763_v44  ;;  %v4975_v45 = vrot.slane %v549_v25, %v3763_v44  ;;  %s3411_s0 = scalar_lea.vmem %s3268_s16, 1792  ;;  %p3416_p1 = scmp.lt.s32.totalorder %s3268_s16, %s3268_s16 }
  0xbd   :  { %6285 = vst [vmem:[#allocation158_spill] sm:$0xff] %v4911_v9  ;;  %v2459_v9 = vcombine.high %v3407_v6, %v3407_v6  ;;  %v2259_v10 = vrot.slane %v2245_v31, %v3763_v44  ;;  %v335_v6 = vcombine.high %v333_v38, %v333_v38  ;;  %v4956_v1 = vrot.slane %v2045_v11, %v3763_v44  ;;  %p3412_p0 = scmp.ne.s32.totalorder %s3268_s16, %s3411_s0  ;;  %p3417_p2 = scmp.lt.s32.totalorder %s3411_s0, %s3411_s0 }
  0xbe   :  { %6287 = vst [vmem:[#allocation160_spill] sm:$0xff] %v4924_v28  ;;  %v3101_v28 = vcombine.high %v3410_v24, %v3410_v24  ;;  %v2687_v20 = vrot.slane %v2673_v62, %v3763_v44  ;;  %v4972_v62 = vrot.slane %v2901_v58, %v3763_v44  ;;  %6294 = vst [vmem:[#allocation167_spill] sm:$0xff] %v4975_v45 }
  0xbf   :  { %v2473_v51 = vrot.slane %v2459_v9, %v3763_v44  ;;  %6288 = vst [vmem:[#allocation161_spill] sm:$0xff] %v4956_v1  ;;  %v4959_v21 = vrot.slane %v2259_v10, %v3763_v44  ;;  %v4963_v4 = vrot.slane %v335_v6, %v3763_v44  ;;  %v977_v6 = vcombine.high %v4872_v18, %v4872_v18  ;;  %p3418_p3 = por %p3417_p2, %p3416_p1 }
  0xc0   :  { %v3115_v31 = vrot.slane %v3101_v28, %v3763_v44  ;;  %v4969_v9 = vrot.slane %v2687_v20, %v3763_v44  ;;  %6293 = vst [vmem:[#allocation166_spill] sm:$0xff] %v4972_v62  ;;  %v1191_v55 = vcombine.high %v4875_v15, %v4875_v15  ;;  %v1405_v17 = vcombine.high %v4887_v3, %v4887_v3  ;;  %v6333_v62 = vld [vmem:[#allocation23_spill] sm:$0xff] }
  0xc1   :  { %6289 = vst [vmem:[#allocation162_spill] sm:$0xff] %v4959_v21  ;;  %6290 = vst [vmem:[#allocation163_spill] sm:$0xff] %v4963_v4  ;;  %v4966_v38 = vrot.slane %v2473_v51, %v3763_v44  ;;  %v763_v21 = vcombine.high %v4869_v26, %v4869_v26  ;;  %v1619_v25 = vcombine.high %v4890_v8, %v4890_v8  ;;  %p3419_p4 = pnand %p3418_p3, %p3412_p0 }
  0xc2   :  { %6292 = vst [vmem:[#allocation165_spill] sm:$0xff] %v4969_v9  ;;  %v4982_v24 = vrot.slane %v3115_v31, %v3763_v44  ;;  %v1833_v4 = vcombine.high %v1831_v35, %v1831_v35  ;;  %v2047_v53 = vcombine.high %v2045_v11, %v2045_v11  ;;  %v5010_v28 = vrot.slane %v977_v6, %v3763_v44  ;;  %v6335_v9 = vld [vmem:[#allocation24_spill] sm:$0xff] }
  0xc3   :  { %6291 = vst [vmem:[#allocation164_spill] sm:$0xff] %v4966_v38  ;;  %v5007_v45 = vrot.slane %v763_v21, %v3763_v44  ;;  %v5013_v26 = vrot.slane %v1191_v55, %v3763_v44  ;;  %v2261_v18 = vcombine.high %v2259_v10, %v2259_v10  ;;  %v5016_v15 = vrot.slane %v1405_v17, %v3763_v44  ;;  %v6337_v38 = vld [vmem:[#allocation25_spill] sm:$0xff] }
  0xc4   :  { %6295 = vst [vmem:[#allocation168_spill] sm:$0xff] %v4982_v24  ;;  %6297 = vst [vmem:[#allocation170_spill] sm:$0xff] %v5010_v28  ;;  %v5019_v3 = vrot.slane %v1619_v25, %v3763_v44  ;;  %v5022_v8 = vrot.slane %v1833_v4, %v3763_v44  ;;  %v5025_v35 = vrot.slane %v2047_v53, %v3763_v44  ;;  %v6331_v24 = vld [vmem:[#allocation22_spill] sm:$0xff] }
  0xc5   :  { %6296 = vst [vmem:[#allocation169_spill] sm:$0xff] %v5007_v45  ;;  %6298 = vst [vmem:[#allocation171_spill] sm:$0xff] %v5013_v26  ;;  %v5034_v17 = vrot.slane %v2261_v18, %v3763_v44  ;;  %v2475_v55 = vcombine.high %v2473_v51, %v2473_v51  ;;  %v2689_v10 = vcombine.high %v2687_v20, %v2687_v20  ;;  %v6313_v20 = vld [vmem:[#allocation13_spill] sm:$0xff] }
  0xc6   :  { %6299 = vst [vmem:[#allocation172_spill] sm:$0xff] %v5016_v15  ;;  %6300 = vst [vmem:[#allocation173_spill] sm:$0xff] %v5019_v3  ;;  %v2903_v11 = vcombine.high %v2901_v58, %v2901_v58  ;;  %v3117_v18 = vcombine.high %v3115_v31, %v3115_v31  ;;  %v365_v26 = vcombine.high %v4881_v29, %v4881_v29  ;;  %v6352_v29 = vld [vmem:[#allocation29_spill] sm:$0xff] }
  0xc7   :  { %6301 = vst [vmem:[#allocation174_spill] sm:$0xff] %v5022_v8  ;;  %6302 = vst [vmem:[#allocation175_spill] sm:$0xff] %v5025_v35  ;;  %v579_v21 = vcombine.high %v4884_v7, %v4884_v7  ;;  %v793_v4 = vcombine.high %v4894_v22, %v4894_v22  ;;  %v5053_v53 = vrot.slane %v2475_v55, %v3763_v44  ;;  %v6315_v8 = vld [vmem:[#allocation14_spill] sm:$0xff]  ;;  %v6350_v7 = vld [vmem:[#allocation28_spill] sm:$0xff] }
  0xc8   :  { %6303 = vst [vmem:[#allocation176_spill] sm:$0xff] %v5034_v17  ;;  %v5056_v6 = vrot.slane %v2689_v10, %v3763_v44  ;;  %v5059_v51 = vrot.slane %v2903_v11, %v3763_v44  ;;  %v5066_v25 = vrot.slane %v3117_v18, %v3763_v44  ;;  %v5069_v17 = vrot.slane %v365_v26, %v3784_v54  ;;  %v6311_v11 = vld [vmem:[#allocation12_spill] sm:$0xff]  ;;  %v6317_v26 = vld [vmem:[#allocation15_spill] sm:$0xff] }
  0xc9   :  { %6304 = vst [vmem:[#allocation177_spill] sm:$0xff] %v5053_v53  ;;  %v5072_v55 = vrot.slane %v579_v21, %v3784_v54  ;;  %v5075_v10 = vrot.slane %v793_v4, %v3784_v54  ;;  %v6314_v53 = vrot.slane %v6313_v20, %v3784_v54  ;;  %v6316_v44 = vrot.slane %v6315_v8, %v3784_v54  ;;  %v6319_v4 = vld [vmem:[#allocation16_spill] sm:$0xff]  ;;  %v6323_v20 = vld [vmem:[#allocation18_spill] sm:$0xff]  ;;  %v6325_v8 = vld [vmem:[#allocation19_spill] sm:$0xff] }
  0xca   :  { %6305 = vst [vmem:[#allocation178_spill] sm:$0xff] %v5056_v6  ;;  %6306 = vst [vmem:[#allocation179_spill] sm:$0xff] %v5059_v51  ;;  %v6312_v51 = vrot.slane %v6311_v11, %v3784_v54  ;;  %v6321_v11 = vld [vmem:[#allocation17_spill] sm:$0xff] }
  0xcb   :  { %6307 = vst [vmem:[#allocation180_spill] sm:$0xff] %v5066_v25  ;;  %6308 = vst [vmem:[#allocation181_spill] sm:$0xff] %v5069_v17  ;;  %v6318_v17 = vrot.slane %v6317_v26, %v3784_v54  ;;  %v6327_v26 = vld [vmem:[#allocation20_spill] sm:$0xff] }
  0xcc   :  { %6309 = vst [vmem:[#allocation182_spill] sm:$0xff] %v5072_v55  ;;  %6310 = vst [vmem:[#allocation183_spill] sm:$0xff] %v5075_v10  ;;  %v6320_v10 = vrot.slane %v6319_v4, %v3784_v54 }
 0x10e   :  { %v187_v58 = vpop.f32.mrb[0].mxu0  ;;  %v5063_v31 = vpop.f32.mrb[0].mxu1 }
 0x10f   :  { %v448_v6 = vmul.f32 %v6312_v51, %v187_v58  ;;  %v662_v35 = vmul.f32 %v6314_v53, %v187_v58  ;;  %v876_v18 = vmul.f32 %v6316_v44, %v187_v58  ;;  %v1090_v21 = vmul.f32 %v6318_v17, %v187_v58  ;;  %v189_v55 = vpop.f32.mrb[1].mxu0  ;;  %v229_v25 = vpop.f32.mrb[1].mxu1 }
 0x110   :  { %v1304_v3 = vmul.f32 %v6320_v10, %v187_v58  ;;  %v6322_v51 = vrot.slane %v6321_v11, %v3784_v54  ;;  %v6324_v53 = vrot.slane %v6323_v20, %v3784_v54  ;;  %v6326_v44 = vrot.slane %v6325_v8, %v3784_v54  ;;  %v6329_v55 = vld [vmem:[#allocation21_spill] sm:$0xff] }
 0x111   :  { %v6328_v17 = vrot.slane %v6327_v26, %v3784_v54  ;;  %v6330_v4 = vrot.slane %v6329_v55, %v3784_v54  ;;  %v6332_v11 = vrot.slane %v6331_v24, %v3784_v54  ;;  %v6334_v20 = vrot.slane %v6333_v62, %v3784_v54  ;;  %v6339_v55 = vld [vmem:[#allocation68_spill] sm:$0xff]  ;;  %v6342_v24 = vld [vmem:[#allocation69_spill] sm:$0xff] }
 0x112   :  { %v1518_v15 = vmul.f32 %v6322_v51, %v187_v58  ;;  %v1732_v28 = vmul.f32 %v6324_v53, %v187_v58  ;;  %v1946_v45 = vmul.f32 %v6326_v44, %v187_v58  ;;  %v6336_v8 = vrot.slane %v6335_v9, %v3784_v54  ;;  %v192_v1 = vpop.f32.mrb[2].mxu0  ;;  %v6346_v9 = vld [vmem:[#allocation26_spill] sm:$0xff] }
 0x113   :  { %v2160_v25 = vmul.f32 %v6328_v17, %v187_v58  ;;  %v2374_v10 = vmul.f32 %v6330_v4, %v187_v58  ;;  %v2588_v51 = vmul.f32 %v6332_v11, %v187_v58  ;;  %v2802_v53 = vmul.f32 %v6334_v20, %v187_v58  ;;  %v5131_v20 = vpop.f32.mrb[2].mxu1 }
 0x114   :  { %v3016_v44 = vmul.f32 %v6336_v8, %v187_v58  ;;  %v6338_v26 = vrot.slane %v6337_v38, %v3784_v54  ;;  %v6340_v4 = vrot.slane %v6339_v55, %v3784_v54  ;;  %v6343_v62 = vrot.slane %v6342_v24, %v3784_v54  ;;  %6345 = vst [vmem:[#allocation14_spill] sm:$0xff] %v5131_v20 }
 0x115   :  { %v6347_v8 = vrot.slane %v6346_v9, %v3784_v54  ;;  %v6351_v55 = vrot.slane %v6350_v7, %v3784_v54  ;;  %v1305_v19 = vmul.f32 %v6355_v33, %v192_v1  ;;  %v6356_v9 = vld [vmem:[#allocation31_spill] sm:$0xff]  ;;  %v6360_v7 = vld [vmem:[#allocation33_spill] sm:$0xff] }
 0x116   :  { %v3230_v17 = vmul.f32 %v6338_v26, %v187_v58  ;;  %v5123_v60 = vmul.f32 %v6340_v4, %v5063_v31  ;;  %v5129_v11 = vmul.f32 %v6343_v62, %v5063_v31  ;;  %v6348_v58 = vld [vmem:[#allocation27_spill] sm:$0xff]  ;;  %v194_v62 = vpop.f32.mrb[3].mxu0 }
 0x117   :  { %v449_v38 = vmul.f32 %v6347_v8, %v192_v1  ;;  %v6349_v26 = vrot.slane %v6348_v58, %v3784_v54  ;;  %v877_v4 = vmul.f32 %v6351_v55, %v192_v1  ;;  %v6357_v8 = vrot.slane %v6356_v9, %v3784_v54  ;;  %v6358_v58 = vld [vmem:[#allocation32_spill] sm:$0xff]  ;;  %v197_v23 = vpop.f32.mrb[4].mxu0  ;;  %v6363_v9 = vld [vmem:[#allocation34_spill] sm:$0xff] }
 0x118   :  { %6341 = vst [vmem:[#allocation12_spill] sm:$0xff] %v5123_v60  ;;  %6344 = vst [vmem:[#allocation13_spill] sm:$0xff] %v5129_v11  ;;  %v6353_v60 = vrot.slane %v6352_v29, %v3784_v54  ;;  %v234_v11 = vpop.f32.mrb[3].mxu1  ;;  %v6361_v55 = vrot.slane %v6360_v7, %v3784_v54  ;;  %v1320_v47 = vadd.f32 %v1305_v19, %v1304_v3  ;;  %v6373_v3 = vld [vmem:[#allocation39_spill] sm:$0xff] }
 0x119   :  { %v663_v22 = vmul.f32 %v6349_v26, %v192_v1  ;;  %v1519_v5 = vmul.f32 %v6357_v8, %v192_v1  ;;  %v6359_v26 = vrot.slane %v6358_v58, %v3784_v54  ;;  %v464_v29 = vadd.f32 %v449_v38, %v448_v6  ;;  %v5157_v36 = vpop.f32.mrb[4].mxu1  ;;  %v6369_v6 = vld [vmem:[#allocation37_spill] sm:$0xff]  ;;  %v6375_v38 = vld [vmem:[#allocation40_spill] sm:$0xff] }
 0x11a   :  { %v1091_v24 = vmul.f32 %v6353_v60, %v192_v1  ;;  %v1947_v50 = vmul.f32 %v6361_v55, %v192_v1  ;;  %v892_v62 = vadd.f32 %v877_v4, %v876_v18  ;;  %6362 = vst [vmem:[#allocation15_spill] sm:$0xff] %v5157_v36  ;;  %v6364_v8 = vrot.slane %v6363_v9, %v3784_v54  ;;  %v6367_v55 = vld [vmem:[#allocation36_spill] sm:$0xff]  ;;  %v239_v19 = vpop.f32.mrb[5].mxu1  ;;  %v6376_v4 = vld [vmem:[#allocation41_spill] sm:$0xff] }
 0x11b   :  { %v1733_v63 = vmul.f32 %v6359_v26, %v192_v1  ;;  %v678_v60 = vadd.f32 %v663_v22, %v662_v35  ;;  %v1534_v56 = vadd.f32 %v1519_v5, %v1518_v15  ;;  %v6365_v26 = vld [vmem:[#allocation35_spill] sm:$0xff]  ;;  %v6368_v22 = vrot.slane %v6367_v55, %v3784_v54 }
 0x11c   :  { %v1106_v11 = vadd.f32 %v1091_v24, %v1090_v21  ;;  %v1962_v33 = vadd.f32 %v1947_v50, %v1946_v45  ;;  %v2161_v58 = vmul.f32 %v6364_v8, %v192_v1  ;;  %v6366_v20 = vrot.slane %v6365_v26, %v3784_v54  ;;  %v199_v50 = vpop.f32.mrb[5].mxu0  ;;  %v6371_v45 = vld [vmem:[#allocation38_spill] sm:$0xff] }
 0x11d   :  { %v1748_v46 = vadd.f32 %v1733_v63, %v1732_v28  ;;  %v2589_v35 = vmul.f32 %v6368_v22, %v192_v1  ;;  %v6370_v5 = vrot.slane %v6369_v6, %v3784_v54  ;;  %v6372_v28 = vrot.slane %v6371_v45, %v3784_v54  ;;  %v5179_v19 = vpop.f32.mrb[6].mxu0  ;;  %v5181_v45 = vpop.f32.mrb[6].mxu1 }
 0x11e   :  { %v2375_v7 = vmul.f32 %v6366_v20, %v192_v1  ;;  %v6374_v18 = vrot.slane %v6373_v3, %v3784_v54  ;;  %v450_v20 = vmul.f32 %v6375_v38, %v197_v23  ;;  %v664_v24 = vmul.f32 %v6376_v4, %v197_v23  ;;  %6377 = vst [vmem:[#allocation16_spill] sm:$0xff] %v5181_v45  ;;  %v6379_v3 = vld [vmem:[#allocation43_spill] sm:$0xff]  ;;  %v6388_v45 = vld [vmem:[#allocation52_spill] sm:$0xff] }
 0x11f   :  { %v2803_v63 = vmul.f32 %v6370_v5, %v192_v1  ;;  %v3017_v15 = vmul.f32 %v6372_v28, %v192_v1  ;;  %v2176_v9 = vadd.f32 %v2161_v58, %v2160_v25  ;;  %v2604_v26 = vadd.f32 %v2589_v35, %v2588_v51  ;;  %v6378_v28 = vld [vmem:[#allocation42_spill] sm:$0xff]  ;;  %v204_v25 = vpop.f32.mrb[7].mxu0  ;;  %v6385_v58 = vld [vmem:[#allocation49_spill] sm:$0xff] }
 0x120   :  { %v3231_v21 = vmul.f32 %v6374_v18, %v192_v1  ;;  %v2390_v8 = vadd.f32 %v2375_v7, %v2374_v10  ;;  %v465_v5 = vadd.f32 %v464_v29, %v450_v20  ;;  %v679_v50 = vadd.f32 %v678_v60, %v664_v24  ;;  %v6380_v18 = vld [vmem:[#allocation44_spill] sm:$0xff]  ;;  %v244_v10 = vpop.f32.mrb[7].mxu1  ;;  %v6382_v51 = vld [vmem:[#allocation46_spill] sm:$0xff] }
 0x121   :  { %v2818_v55 = vadd.f32 %v2803_v63, %v2802_v53  ;;  %v3032_v22 = vadd.f32 %v3017_v15, %v3016_v44  ;;  %v878_v36 = vmul.f32 %v6378_v28, %v197_v23  ;;  %v1092_v1 = vmul.f32 %v6379_v3, %v197_v23  ;;  %v6383_v44 = vld [vmem:[#allocation47_spill] sm:$0xff]  ;;  %v6384_v29 = vld [vmem:[#allocation48_spill] sm:$0xff]  ;;  %v6386_v25 = vld [vmem:[#allocation50_spill] sm:$0xff] }
 0x122   :  { %v3246_v6 = vadd.f32 %v3231_v21, %v3230_v17  ;;  %v1306_v38 = vmul.f32 %v6380_v18, %v197_v23  ;;  %v1520_v4 = vmul.f32 %v6381_v57, %v197_v23  ;;  %v1734_v53 = vmul.f32 %v6382_v51, %v197_v23  ;;  %v5191_v18 = vpop.f32.mrb[8].mxu0  ;;  %v5193_v57 = vpop.f32.mrb[8].mxu1  ;;  %v6387_v51 = vld [vmem:[#allocation51_spill] sm:$0xff] }
 0x123   :  { %v1948_v17 = vmul.f32 %v6383_v44, %v197_v23  ;;  %v2162_v60 = vmul.f32 %v6384_v29, %v197_v23  ;;  %v2376_v7 = vmul.f32 %v6385_v58, %v197_v23  ;;  %v893_v35 = vadd.f32 %v892_v62, %v878_v36  ;;  %v209_v36 = vpop.f32.mrb[9].mxu0  ;;  %v249_v62 = vpop.f32.mrb[9].mxu1 }
 0x124   :  { %v1107_v63 = vadd.f32 %v1106_v11, %v1092_v1  ;;  %v1321_v15 = vadd.f32 %v1320_v47, %v1306_v38  ;;  %v1535_v21 = vadd.f32 %v1534_v56, %v1520_v4  ;;  %v1749_v20 = vadd.f32 %v1748_v46, %v1734_v53  ;;  %v6390_v56 = vld [vmem:[#allocation54_spill] sm:$0xff]  ;;  %v6391_v11 = vld [vmem:[#allocation55_spill] sm:$0xff] }
 0x125   :  { %v1963_v24 = vadd.f32 %v1962_v33, %v1948_v17  ;;  %v2177_v28 = vadd.f32 %v2176_v9, %v2162_v60  ;;  %v2391_v3 = vadd.f32 %v2390_v8, %v2376_v7  ;;  %v2590_v10 = vmul.f32 %v6386_v25, %v197_v23  ;;  %v6392_v33 = vld [vmem:[#allocation56_spill] sm:$0xff]  ;;  %v6393_v8 = vld [vmem:[#allocation57_spill] sm:$0xff]  ;;  %v5207_v7 = vpop.f32.mrb[10].mxu0  ;;  %v5209_v25 = vpop.f32.mrb[10].mxu1  ;;  %v6396_v62 = vld [vmem:[#allocation59_spill] sm:$0xff] }
 0x126   :  { %v2804_v44 = vmul.f32 %v6387_v51, %v197_v23  ;;  %v3018_v29 = vmul.f32 %v6388_v45, %v197_v23  ;;  %v3232_v58 = vmul.f32 %v6389_v59, %v197_v23  ;;  %v451_v47 = vmul.f32 %v6390_v56, %v5179_v19  ;;  %6394 = vst [vmem:[#allocation17_spill] sm:$0xff] %v5209_v25  ;;  %v6395_v51 = vld [vmem:[#allocation58_spill] sm:$0xff] }
 0x127   :  { %v665_v46 = vmul.f32 %v6391_v11, %v5179_v19  ;;  %v879_v9 = vmul.f32 %v6392_v33, %v5179_v19  ;;  %v1093_v1 = vmul.f32 %v6393_v8, %v5179_v19  ;;  %v2605_v38 = vadd.f32 %v2604_v26, %v2590_v10  ;;  %v6397_v11 = vld [vmem:[#allocation60_spill] sm:$0xff] }
 0x128   :  { %v2819_v4 = vadd.f32 %v2818_v55, %v2804_v44  ;;  %v3033_v53 = vadd.f32 %v3032_v22, %v3018_v29  ;;  %v3247_v45 = vadd.f32 %v3246_v6, %v3232_v58  ;;  %v466_v17 = vadd.f32 %v465_v5, %v451_v47  ;;  %v6398_v55 = vld [vmem:[#allocation61_spill] sm:$0xff]  ;;  %v214_v6 = vpop.f32.mrb[11].mxu0  ;;  %v254_v5 = vpop.f32.mrb[11].mxu1  ;;  %v6401_v44 = vld [vmem:[#allocation64_spill] sm:$0xff] }
 0x129   :  { %v680_v23 = vadd.f32 %v679_v50, %v665_v46  ;;  %v894_v59 = vadd.f32 %v893_v35, %v879_v9  ;;  %v1108_v60 = vadd.f32 %v1107_v63, %v1093_v1  ;;  %v1307_v36 = vmul.f32 %v6395_v51, %v5179_v19  ;;  %v6399_v50 = vld [vmem:[#allocation62_spill] sm:$0xff]  ;;  %v6400_v63 = vld [vmem:[#allocation63_spill] sm:$0xff]  ;;  %v6402_v58 = vld [vmem:[#allocation65_spill] sm:$0xff]  ;;  %v5229_v6 = vpop.f32.mrb[12].mxu1 }
 0x12a   :  { %v1521_v56 = vmul.f32 %v6396_v62, %v5179_v19  ;;  %v1735_v26 = vmul.f32 %v6397_v11, %v5179_v19  ;;  %v1949_v22 = vmul.f32 %v6398_v55, %v5179_v19  ;;  %v2163_v35 = vmul.f32 %v6399_v50, %v5179_v19  ;;  %v5227_v55 = vpop.f32.mrb[12].mxu0  ;;  %6403 = vst [vmem:[#allocation18_spill] sm:$0xff] %v5229_v6  ;;  %v6404_v5 = vld [vmem:[#allocation66_spill] sm:$0xff] }
 0x12b   :  { %v2377_v10 = vmul.f32 %v6400_v63, %v5179_v19  ;;  %v2591_v29 = vmul.f32 %v6401_v44, %v5179_v19  ;;  %v2805_v47 = vmul.f32 %v6402_v58, %v5179_v19  ;;  %v1322_v46 = vadd.f32 %v1321_v15, %v1307_v36  ;;  %v6405_v63 = vld [vmem:[#allocation67_spill] sm:$0xff]  ;;  %v6406_v58 = vld [vmem:[#allocation70_spill] sm:$0xff] }
 0x12c   :  { %v1536_v33 = vadd.f32 %v1535_v21, %v1521_v56  ;;  %v1750_v9 = vadd.f32 %v1749_v20, %v1735_v26  ;;  %v1964_v8 = vadd.f32 %v1963_v24, %v1949_v22  ;;  %v2178_v1 = vadd.f32 %v2177_v28, %v2163_v35  ;;  %v6408_v20 = vld [vmem:[#allocation71_spill] sm:$0xff] }
 0x12d   :  { %v2392_v51 = vadd.f32 %v2391_v3, %v2377_v10  ;;  %v2606_v62 = vadd.f32 %v2605_v38, %v2591_v29  ;;  %v2820_v11 = vadd.f32 %v2819_v4, %v2805_v47  ;;  %v3019_v50 = vmul.f32 %v6404_v5, %v5179_v19  ;;  %v219_v3 = vpop.f32.mrb[13].mxu0  ;;  %v259_v38 = vpop.f32.mrb[13].mxu1  ;;  %v6410_v4 = vld [vmem:[#allocation72_spill] sm:$0xff] }
 0x12e   :  { %v3233_v44 = vmul.f32 %v6405_v63, %v5179_v19  ;;  %v6407_v15 = vrot.slane %v6406_v58, %v3784_v54  ;;  %v6409_v24 = vrot.slane %v6408_v20, %v3784_v54  ;;  %v6411_v36 = vrot.slane %v6410_v4, %v3784_v54  ;;  %v5309_v20 = vpop.f32.mrb[14].mxu1 }
 0x12f   :  { %v6412_v19 = vrot.slane %v4129_v41, %v3784_v54  ;;  %v6413_v22 = vrot.slane %v4133_v13, %v3784_v54  ;;  %v6414_v10 = vrot.slane %v4143_v16, %v3784_v54  ;;  %v3034_v47 = vadd.f32 %v3033_v53, %v3019_v50  ;;  %6421 = vst [vmem:[#allocation19_spill] sm:$0xff] %v5309_v20 }
 0x130   :  { %v5239_v21 = vmul.f32 %v6407_v15, %v5063_v31  ;;  %v5245_v28 = vmul.f32 %v6409_v24, %v5063_v31  ;;  %v5251_v56 = vmul.f32 %v6411_v36, %v5063_v31  ;;  %v3248_v5 = vadd.f32 %v3247_v45, %v3233_v44 }
 0x131   :  { %v5257_v26 = vmul.f32 %v6412_v19, %v5063_v31  ;;  %v5263_v35 = vmul.f32 %v6413_v22, %v5063_v31  ;;  %v5269_v29 = vmul.f32 %v6414_v10, %v5063_v31  ;;  %v6415_v41 = vrot.slane %v4183_v30, %v3784_v54  ;;  %v264_v19 = vpop.f32.mrb[15].mxu1 }
 0x132   :  { %v6416_v13 = vrot.slane %v4187_v34, %v3784_v54  ;;  %v6417_v16 = vrot.slane %v4191_v37, %v3784_v54  ;;  %v6418_v53 = vrot.slane %v4197_v43, %v3784_v54  ;;  %v6419_v30 = vrot.slane %v4201_v0, %v3784_v54  ;;  %v5307_v37 = vpop.f32.mrb[14].mxu0 }
 0x133   :  { %v5275_v63 = vmul.f32 %v6415_v41, %v5063_v31  ;;  %v6420_v34 = vrot.slane %v4205_v39, %v3784_v54  ;;  %v6422_v43 = vrot.slane %v4227_v52, %v3784_v54  ;;  %v6423_v0 = vrot.slane %v4231_v2, %v3784_v54  ;;  %v224_v36 = vpop.f32.mrb[15].mxu0 }
 0x134   :  { %v5281_v58 = vmul.f32 %v6416_v13, %v5063_v31  ;;  %v5287_v15 = vmul.f32 %v6417_v16, %v5063_v31  ;;  %v5293_v45 = vmul.f32 %v6418_v53, %v5063_v31  ;;  %v5299_v50 = vmul.f32 %v6419_v30, %v5063_v31 }
 0x135   :  { %v5305_v44 = vmul.f32 %v6420_v34, %v5063_v31  ;;  %v452_v24 = vmul.f32 %v6422_v43, %v5191_v18  ;;  %v666_v3 = vmul.f32 %v6423_v0, %v5191_v18  ;;  %v6424_v39 = vrot.slane %v4271_v40, %v3784_v54 }
 0x136   :  { %v6425_v38 = vrot.slane %v4275_v48, %v3784_v54  ;;  %v6426_v52 = vrot.slane %v4279_v49, %v3784_v54  ;;  %v6427_v2 = vrot.slane %v4285_v32, %v3784_v54  ;;  %v6428_v40 = vrot.slane %v4289_v42, %v3784_v54  ;;  %v6430_v32 = vld [vmem:[#allocation5_spill] sm:$0xff] }
 0x137   :  { %v880_v31 = vmul.f32 %v6424_v39, %v5191_v18  ;;  %v6429_v48 = vrot.slane %v4293_v61, %v3784_v54  ;;  %v467_v16 = vadd.f32 %v466_v17, %v452_v24  ;;  %v681_v53 = vadd.f32 %v680_v23, %v666_v3  ;;  %v6439_v24 = vld [vmem:[#allocation14_spill] sm:$0xff]  ;;  %v6440_v3 = vld [vmem:[#allocation7_spill] sm:$0xff] }
 0x138   :  { %v1094_v4 = vmul.f32 %v6425_v38, %v5191_v18  ;;  %v1308_v22 = vmul.f32 %v6426_v52, %v5191_v18  ;;  %v1522_v10 = vmul.f32 %v6427_v2, %v5191_v18  ;;  %v1736_v41 = vmul.f32 %v6428_v40, %v5191_v18 }
 0x139   :  { %v1950_v13 = vmul.f32 %v6429_v48, %v5191_v18  ;;  %v895_v30 = vadd.f32 %v894_v59, %v880_v31  ;;  %v6431_v38 = vrot.slane %v6430_v32, %v3784_v54  ;;  %v6432_v42 = vrot.slane %v6244_v14, %v3784_v54 }
 0x13a   :  { %v1109_v49 = vadd.f32 %v1108_v60, %v1094_v4  ;;  %v1323_v34 = vadd.f32 %v1322_v46, %v1308_v22  ;;  %v1537_v43 = vadd.f32 %v1536_v33, %v1522_v10  ;;  %v1751_v0 = vadd.f32 %v1750_v9, %v1736_v41  ;;  %v6435_v60 = vld [vmem:[#allocation9_spill] sm:$0xff]  ;;  %v6437_v9 = vld [vmem:[#allocation10_spill] sm:$0xff]  ;;  %v6442_v4 = vld [vmem:[#allocation8_spill] sm:$0xff] }
 0x13b   :  { %v1965_v39 = vadd.f32 %v1964_v8, %v1950_v13  ;;  %v2164_v36 = vmul.f32 %v6431_v38, %v5191_v18  ;;  %v2378_v19 = vmul.f32 %v6432_v42, %v5191_v18  ;;  %v6433_v61 = vrot.slane %v4359_v27, %v3784_v54  ;;  %v6446_v38 = vld [vmem:[#allocation73_spill] sm:$0xff] }
 0x13c   :  { %v6434_v23 = vrot.slane %v4363_v12, %v3784_v54  ;;  %v6436_v46 = vrot.slane %v6435_v60, %v3784_v54  ;;  %v6438_v14 = vrot.slane %v6437_v9, %v3784_v54  ;;  %v6441_v27 = vrot.slane %v6440_v3, %v3784_v54 }
 0x13d   :  { %v2592_v17 = vmul.f32 %v6433_v61, %v5191_v18  ;;  %v6443_v12 = vrot.slane %v6442_v4, %v3784_v54  ;;  %v2179_v22 = vadd.f32 %v2178_v1, %v2164_v36  ;;  %v2393_v2 = vadd.f32 %v2392_v51, %v2378_v19 }
 0x13e   :  { %v2806_v59 = vmul.f32 %v6434_v23, %v5191_v18  ;;  %v3020_v33 = vmul.f32 %v6436_v46, %v5191_v18  ;;  %v3234_v8 = vmul.f32 %v6438_v14, %v5191_v18  ;;  %v5371_v31 = vmul.f32 %v6441_v27, %v6439_v24  ;;  %v6444_v18 = vld [vmem:[#allocation11_spill] sm:$0xff]  ;;  %v6448_v23 = vld [vmem:[#allocation74_spill] sm:$0xff]  ;;  %v6461_v27 = vld [vmem:[#allocation80_spill] sm:$0xff] }
 0x13f   :  { %v5377_v52 = vmul.f32 %v6443_v12, %v6439_v24  ;;  %v2607_v10 = vadd.f32 %v2606_v62, %v2592_v17  ;;  %v6445_v13 = vrot.slane %v6444_v18, %v3784_v54  ;;  %v6447_v42 = vrot.slane %v6446_v38, %v3784_v54  ;;  %v6450_v62 = vld [vmem:[#allocation75_spill] sm:$0xff]  ;;  %v6454_v17 = vld [vmem:[#allocation77_spill] sm:$0xff]  ;;  %v6456_v46 = vld [vmem:[#allocation78_spill] sm:$0xff] }
 0x140   :  { %v2821_v40 = vadd.f32 %v2820_v11, %v2806_v59  ;;  %v3035_v41 = vadd.f32 %v3034_v47, %v3020_v33  ;;  %v3249_v48 = vadd.f32 %v3248_v5, %v3234_v8  ;;  %v6449_v1 = vrot.slane %v6448_v23, %v3784_v54  ;;  %v6452_v5 = vld [vmem:[#allocation76_spill] sm:$0xff]  ;;  %v6458_v14 = vld [vmem:[#allocation79_spill] sm:$0xff]  ;;  %v6464_v18 = vld [vmem:[#allocation81_spill] sm:$0xff] }
 0x141   :  { %v5383_v32 = vmul.f32 %v6445_v13, %v6439_v24  ;;  %v5389_v61 = vmul.f32 %v6447_v42, %v6439_v24  ;;  %v6451_v11 = vrot.slane %v6450_v62, %v3784_v54  ;;  %v6453_v36 = vrot.slane %v6452_v5, %v3784_v54  ;;  %v6467_v42 = vld [vmem:[#allocation82_spill] sm:$0xff]  ;;  %v6470_v62 = vld [vmem:[#allocation83_spill] sm:$0xff] }
 0x142   :  { %v5395_v51 = vmul.f32 %v6449_v1, %v6439_v24  ;;  %v6455_v59 = vrot.slane %v6454_v17, %v3784_v54  ;;  %v6457_v33 = vrot.slane %v6456_v46, %v3784_v54  ;;  %v6459_v8 = vrot.slane %v6458_v14, %v3784_v54  ;;  %v6475_v46 = vld [vmem:[#allocation85_spill] sm:$0xff] }
 0x143   :  { %v5401_v47 = vmul.f32 %v6451_v11, %v6439_v24  ;;  %v5407_v19 = vmul.f32 %v6453_v36, %v6439_v24  ;;  %v6462_v4 = vrot.slane %v6461_v27, %v3784_v54  ;;  %v6465_v13 = vrot.slane %v6464_v18, %v3784_v54  ;;  %v6473_v36 = vld [vmem:[#allocation84_spill] sm:$0xff]  ;;  %v6479_v18 = vld [vmem:[#allocation87_spill] sm:$0xff] }
 0x144   :  { %v5413_v60 = vmul.f32 %v6455_v59, %v6439_v24  ;;  %v5419_v9 = vmul.f32 %v6457_v33, %v6439_v24  ;;  %v5425_v3 = vmul.f32 %v6459_v8, %v6439_v24  ;;  %v6468_v23 = vrot.slane %v6467_v42, %v3784_v54  ;;  %v6477_v8 = vld [vmem:[#allocation86_spill] sm:$0xff]  ;;  %v6481_v42 = vld [vmem:[#allocation88_spill] sm:$0xff] }
 0x145   :  { %v5431_v12 = vmul.f32 %v6462_v4, %v6439_v24  ;;  %v5437_v38 = vmul.f32 %v6465_v13, %v6439_v24  ;;  %v6471_v11 = vrot.slane %v6470_v62, %v3784_v54  ;;  %v6474_v17 = vrot.slane %v6473_v36, %v3784_v54 }
 0x146   :  { %6460 = vst [vmem:[#allocation20_spill] sm:$0xff] %v5425_v3  ;;  %v5443_v1 = vmul.f32 %v6468_v23, %v6439_v24  ;;  %v6476_v33 = vrot.slane %v6475_v46, %v3784_v54  ;;  %v6478_v27 = vrot.slane %v6477_v8, %v3784_v54  ;;  %v6482_v23 = vrot.slane %v6481_v42, %v3784_v54  ;;  %v6485_v8 = vld [vmem:[#allocation90_spill] sm:$0xff] }
 0x147   :  { %6463 = vst [vmem:[#allocation21_spill] sm:$0xff] %v5431_v12  ;;  %6466 = vst [vmem:[#allocation22_spill] sm:$0xff] %v5437_v38  ;;  %v5449_v5 = vmul.f32 %v6471_v11, %v6439_v24  ;;  %v453_v59 = vmul.f32 %v6474_v17, %v5207_v7  ;;  %v6480_v24 = vrot.slane %v6479_v18, %v3784_v54  ;;  %v6483_v11 = vld [vmem:[#allocation89_spill] sm:$0xff]  ;;  %v6487_v18 = vld [vmem:[#allocation91_spill] sm:$0xff] }
 0x148   :  { %6469 = vst [vmem:[#allocation23_spill] sm:$0xff] %v5443_v1  ;;  %v667_v14 = vmul.f32 %v6476_v33, %v5207_v7  ;;  %v881_v4 = vmul.f32 %v6478_v27, %v5207_v7  ;;  %v1309_v62 = vmul.f32 %v6482_v23, %v5207_v7  ;;  %v6484_v36 = vrot.slane %v6483_v11, %v3784_v54  ;;  %v6489_v11 = vld [vmem:[#allocation92_spill] sm:$0xff]  ;;  %v6540_v3 = vld [vmem:[#allocation122_spill] sm:$0xff] }
 0x149   :  { %6472 = vst [vmem:[#allocation24_spill] sm:$0xff] %v5449_v5  ;;  %v1095_v13 = vmul.f32 %v6480_v24, %v5207_v7  ;;  %v468_v46 = vadd.f32 %v467_v16, %v453_v59  ;;  %v6486_v27 = vrot.slane %v6485_v8, %v3784_v54  ;;  %v6488_v24 = vrot.slane %v6487_v18, %v3784_v54  ;;  %v6491_v59 = vld [vmem:[#allocation93_spill] sm:$0xff]  ;;  %v6493_v8 = vld [vmem:[#allocation94_spill] sm:$0xff]  ;;  %v6501_v18 = vld [vmem:[#allocation15_spill] sm:$0xff] }
 0x14a   :  { %v1523_v17 = vmul.f32 %v6484_v36, %v5207_v7  ;;  %v682_v33 = vadd.f32 %v681_v53, %v667_v14  ;;  %v896_v25 = vadd.f32 %v895_v30, %v881_v4  ;;  %v1324_v23 = vadd.f32 %v1323_v34, %v1309_v62  ;;  %v6497_v34 = vld [vmem:[#allocation96_spill] sm:$0xff] }
 0x14b   :  { %v1737_v20 = vmul.f32 %v6486_v27, %v5207_v7  ;;  %v1951_v6 = vmul.f32 %v6488_v24, %v5207_v7  ;;  %v1110_v42 = vadd.f32 %v1109_v49, %v1095_v13  ;;  %v6490_v16 = vrot.slane %v6489_v11, %v3784_v54  ;;  %v6495_v49 = vld [vmem:[#allocation95_spill] sm:$0xff]  ;;  %v6502_v24 = vld [vmem:[#allocation98_spill] sm:$0xff]  ;;  %v6538_v12 = vld [vmem:[#allocation120_spill] sm:$0xff] }
 0x14c   :  { %v1538_v5 = vadd.f32 %v1537_v43, %v1523_v17  ;;  %v6492_v14 = vrot.slane %v6491_v59, %v3784_v54  ;;  %v6494_v27 = vrot.slane %v6493_v8, %v3784_v54  ;;  %v6498_v43 = vrot.slane %v6497_v34, %v3784_v54 }
 0x14d   :  { %v1752_v1 = vadd.f32 %v1751_v0, %v1737_v20  ;;  %v1966_v38 = vadd.f32 %v1965_v39, %v1951_v6  ;;  %v2165_v53 = vmul.f32 %v6490_v16, %v5207_v7  ;;  %v6496_v20 = vrot.slane %v6495_v49, %v3784_v54  ;;  %v6499_v39 = vld [vmem:[#allocation97_spill] sm:$0xff]  ;;  %v6503_v16 = vld [vmem:[#allocation99_spill] sm:$0xff] }
 0x14e   :  { %v2379_v36 = vmul.f32 %v6492_v14, %v5207_v7  ;;  %v2593_v30 = vmul.f32 %v6494_v27, %v5207_v7  ;;  %v3021_v0 = vmul.f32 %v6498_v43, %v5207_v7  ;;  %v6500_v4 = vrot.slane %v6499_v39, %v3784_v54 }
 0x14f   :  { %v2807_v6 = vmul.f32 %v6496_v20, %v5207_v7  ;;  %v2180_v62 = vadd.f32 %v2179_v22, %v2165_v53  ;;  %v5509_v11 = vmul.f32 %v6502_v24, %v6501_v18  ;;  %v5513_v59 = vmul.f32 %v6503_v16, %v6501_v18  ;;  %v6505_v20 = vld [vmem:[#allocation100_spill] sm:$0xff]  ;;  %v6523_v24 = vld [vmem:[#allocation109_spill] sm:$0xff] }
 0x150   :  { %v3235_v13 = vmul.f32 %v6500_v4, %v5207_v7  ;;  %v2394_v17 = vadd.f32 %v2393_v2, %v2379_v36  ;;  %v2608_v14 = vadd.f32 %v2607_v10, %v2593_v30  ;;  %v3036_v27 = vadd.f32 %v3035_v41, %v3021_v0  ;;  %v6507_v7 = vld [vmem:[#allocation101_spill] sm:$0xff]  ;;  %v6509_v2 = vld [vmem:[#allocation102_spill] sm:$0xff]  ;;  %v6511_v36 = vld [vmem:[#allocation103_spill] sm:$0xff] }
 0x151   :  { %6504 = vst [vmem:[#allocation25_spill] sm:$0xff] %v5513_v59  ;;  %v2822_v8 = vadd.f32 %v2821_v40, %v2807_v6  ;;  %v5517_v34 = vmul.f32 %v6505_v20, %v6501_v18  ;;  %v5521_v22 = vmul.f32 %v6507_v7, %v6501_v18  ;;  %v5525_v53 = vmul.f32 %v6509_v2, %v6501_v18  ;;  %v6513_v10 = vld [vmem:[#allocation104_spill] sm:$0xff]  ;;  %v6515_v41 = vld [vmem:[#allocation105_spill] sm:$0xff]  ;;  %v6517_v30 = vld [vmem:[#allocation106_spill] sm:$0xff] }
 0x152   :  { %v3250_v49 = vadd.f32 %v3249_v48, %v3235_v13  ;;  %v5529_v43 = vmul.f32 %v6511_v36, %v6501_v18  ;;  %v5533_v40 = vmul.f32 %v6513_v10, %v6501_v18  ;;  %v5537_v48 = vmul.f32 %v6515_v41, %v6501_v18  ;;  %v6519_v0 = vld [vmem:[#allocation107_spill] sm:$0xff]  ;;  %v6521_v4 = vld [vmem:[#allocation108_spill] sm:$0xff]  ;;  %v6525_v20 = vld [vmem:[#allocation110_spill] sm:$0xff] }
 0x153   :  { %6506 = vst [vmem:[#allocation68_spill] sm:$0xff] %v5517_v34  ;;  %6508 = vst [vmem:[#allocation69_spill] sm:$0xff] %v5521_v22  ;;  %v5541_v6 = vmul.f32 %v6517_v30, %v6501_v18  ;;  %v5545_v39 = vmul.f32 %v6519_v0, %v6501_v18  ;;  %v5549_v13 = vmul.f32 %v6521_v4, %v6501_v18  ;;  %v6527_v2 = vld [vmem:[#allocation111_spill] sm:$0xff]  ;;  %v6529_v10 = vld [vmem:[#allocation112_spill] sm:$0xff] }
 0x154   :  { %6510 = vst [vmem:[#allocation26_spill] sm:$0xff] %v5525_v53  ;;  %6512 = vst [vmem:[#allocation27_spill] sm:$0xff] %v5529_v43  ;;  %v5553_v16 = vmul.f32 %v6523_v24, %v6501_v18  ;;  %v5557_v7 = vmul.f32 %v6525_v20, %v6501_v18  ;;  %v5561_v36 = vmul.f32 %v6527_v2, %v6501_v18  ;;  %v6530_v30 = vld [vmem:[#allocation113_spill] sm:$0xff]  ;;  %v6531_v4 = vld [vmem:[#allocation114_spill] sm:$0xff] }
 0x155   :  { %6514 = vst [vmem:[#allocation28_spill] sm:$0xff] %v5533_v40  ;;  %6516 = vst [vmem:[#allocation29_spill] sm:$0xff] %v5537_v48  ;;  %v454_v41 = vmul.f32 %v6529_v10, %v5227_v55  ;;  %v668_v0 = vmul.f32 %v6530_v30, %v5227_v55  ;;  %v6532_v24 = vld [vmem:[#allocation115_spill] sm:$0xff]  ;;  %v6535_v18 = vld [vmem:[#allocation118_spill] sm:$0xff] }
 0x156   :  { %6518 = vst [vmem:[#allocation30_spill] sm:$0xff] %v5541_v6  ;;  %6520 = vst [vmem:[#allocation31_spill] sm:$0xff] %v5545_v39  ;;  %v6533_v39 = vld [vmem:[#allocation116_spill] sm:$0xff]  ;;  %v1738_v2 = vmul.f32 %v6535_v18, %v5227_v55  ;;  %v6536_v10 = vld [vmem:[#allocation6_spill] sm:$0xff] }
 0x157   :  { %6522 = vst [vmem:[#allocation32_spill] sm:$0xff] %v5549_v13  ;;  %6524 = vst [vmem:[#allocation33_spill] sm:$0xff] %v5553_v16  ;;  %v882_v13 = vmul.f32 %v6531_v4, %v5227_v55  ;;  %v1096_v16 = vmul.f32 %v6532_v24, %v5227_v55  ;;  %v1310_v20 = vmul.f32 %v6533_v39, %v5227_v55  ;;  %v6537_v34 = vld [vmem:[#allocation119_spill] sm:$0xff]  ;;  %v6539_v59 = vld [vmem:[#allocation121_spill] sm:$0xff] }
 0x158   :  { %6526 = vst [vmem:[#allocation34_spill] sm:$0xff] %v5557_v7  ;;  %6528 = vst [vmem:[#allocation35_spill] sm:$0xff] %v5561_v36  ;;  %v6534_v7 = vld [vmem:[#allocation117_spill] sm:$0xff]  ;;  %v1952_v36 = vmul.f32 %v6536_v10, %v5227_v55  ;;  %v469_v48 = vadd.f32 %v468_v46, %v454_v41  ;;  %v683_v30 = vadd.f32 %v682_v33, %v668_v0  ;;  %v6541_v46 = vld [vmem:[#allocation123_spill] sm:$0xff] }
 0x159   :  { %v1524_v6 = vmul.f32 %v6534_v7, %v5227_v55  ;;  %v897_v40 = vadd.f32 %v896_v25, %v882_v13  ;;  %v1111_v43 = vadd.f32 %v1110_v42, %v1096_v16  ;;  %v1325_v4 = vadd.f32 %v1324_v23, %v1310_v20  ;;  %v6542_v33 = vld [vmem:[#allocation124_spill] sm:$0xff]  ;;  %v6545_v23 = vld [vmem:[#allocation126_spill] sm:$0xff]  ;;  %v6550_v20 = vld [vmem:[#allocation129_spill] sm:$0xff] }
 0x15a   :  { %v1753_v22 = vadd.f32 %v1752_v1, %v1738_v2  ;;  %v1967_v24 = vadd.f32 %v1966_v38, %v1952_v36  ;;  %v2166_v39 = vmul.f32 %v6537_v34, %v5227_v55  ;;  %v2380_v7 = vmul.f32 %v6538_v12, %v5227_v55  ;;  %v6543_v1 = vld [vmem:[#allocation16_spill] sm:$0xff]  ;;  %v6544_v38 = vld [vmem:[#allocation125_spill] sm:$0xff]  ;;  %v6546_v36 = vld [vmem:[#allocation127_spill] sm:$0xff] }
 0x15b   :  { %v1539_v53 = vadd.f32 %v1538_v5, %v1524_v6  ;;  %v2594_v18 = vmul.f32 %v6539_v59, %v5227_v55  ;;  %v2808_v10 = vmul.f32 %v6540_v3, %v5227_v55  ;;  %v3022_v25 = vmul.f32 %v6541_v46, %v5227_v55  ;;  %v6552_v46 = vld [vmem:[#allocation130_spill] sm:$0xff] }
 0x15c   :  { %v3236_v5 = vmul.f32 %v6542_v33, %v5227_v55  ;;  %v5593_v42 = vmul.f32 %v6544_v38, %v6543_v1  ;;  %v5597_v34 = vmul.f32 %v6545_v23, %v6543_v1  ;;  %v2181_v12 = vadd.f32 %v2180_v62, %v2166_v39  ;;  %v6548_v55 = vld [vmem:[#allocation128_spill] sm:$0xff]  ;;  %v6566_v38 = vld [vmem:[#allocation137_spill] sm:$0xff] }
 0x15d   :  { %v2395_v6 = vadd.f32 %v2394_v17, %v2380_v7  ;;  %v2609_v59 = vadd.f32 %v2608_v14, %v2594_v18  ;;  %v2823_v13 = vadd.f32 %v2822_v8, %v2808_v10  ;;  %v3037_v16 = vadd.f32 %v3036_v27, %v3022_v25  ;;  %v6554_v17 = vld [vmem:[#allocation131_spill] sm:$0xff]  ;;  %v6556_v8 = vld [vmem:[#allocation132_spill] sm:$0xff]  ;;  %v6560_v7 = vld [vmem:[#allocation134_spill] sm:$0xff] }
 0x15e   :  { %v3251_v3 = vadd.f32 %v3250_v49, %v3236_v5  ;;  %v5601_v41 = vmul.f32 %v6546_v36, %v6543_v1  ;;  %v5605_v0 = vmul.f32 %v6548_v55, %v6543_v1  ;;  %v5609_v2 = vmul.f32 %v6550_v20, %v6543_v1  ;;  %v6558_v49 = vld [vmem:[#allocation133_spill] sm:$0xff]  ;;  %v6562_v10 = vld [vmem:[#allocation135_spill] sm:$0xff]  ;;  %v6564_v33 = vld [vmem:[#allocation136_spill] sm:$0xff] }
 0x15f   :  { %v5613_v62 = vmul.f32 %v6552_v46, %v6543_v1  ;;  %v5617_v14 = vmul.f32 %v6554_v17, %v6543_v1  ;;  %v5621_v27 = vmul.f32 %v6556_v8, %v6543_v1  ;;  %v5625_v39 = vmul.f32 %v6558_v49, %v6543_v1  ;;  %v6568_v36 = vld [vmem:[#allocation138_spill] sm:$0xff]  ;;  %v6570_v20 = vld [vmem:[#allocation139_spill] sm:$0xff]  ;;  %v6571_v17 = vld [vmem:[#allocation140_spill] sm:$0xff] }
 0x160   :  { %6547 = vst [vmem:[#allocation36_spill] sm:$0xff] %v5601_v41  ;;  %6549 = vst [vmem:[#allocation37_spill] sm:$0xff] %v5605_v0  ;;  %v5629_v18 = vmul.f32 %v6560_v7, %v6543_v1  ;;  %v5633_v25 = vmul.f32 %v6562_v10, %v6543_v1  ;;  %v5637_v5 = vmul.f32 %v6564_v33, %v6543_v1  ;;  %v6572_v49 = vld [vmem:[#allocation141_spill] sm:$0xff]  ;;  %v6573_v10 = vld [vmem:[#allocation142_spill] sm:$0xff] }
 0x161   :  { %6551 = vst [vmem:[#allocation38_spill] sm:$0xff] %v5609_v2  ;;  %6553 = vst [vmem:[#allocation39_spill] sm:$0xff] %v5613_v62  ;;  %v5641_v23 = vmul.f32 %v6566_v38, %v6543_v1  ;;  %v5645_v55 = vmul.f32 %v6568_v36, %v6543_v1  ;;  %v455_v46 = vmul.f32 %v6570_v20, %v5307_v37  ;;  %v6578_v62 = vld [vmem:[#allocation12_spill] sm:$0xff]  ;;  %v6579_v2 = vld [vmem:[#allocation13_spill] sm:$0xff] }
 0x162   :  { %6555 = vst [vmem:[#allocation40_spill] sm:$0xff] %v5617_v14  ;;  %6557 = vst [vmem:[#allocation41_spill] sm:$0xff] %v5621_v27  ;;  %v669_v8 = vmul.f32 %v6571_v17, %v5307_v37  ;;  %v883_v7 = vmul.f32 %v6572_v49, %v5307_v37  ;;  %v1097_v33 = vmul.f32 %v6573_v10, %v5307_v37 }
 0x163   :  { %6559 = vst [vmem:[#allocation42_spill] sm:$0xff] %v5625_v39  ;;  %6561 = vst [vmem:[#allocation43_spill] sm:$0xff] %v5629_v18  ;;  %v470_v1 = vadd.f32 %v469_v48, %v455_v46  ;;  %v6577_v18 = vld [vmem:[#allocation146_spill] sm:$0xff] }
 0x164   :  { %6563 = vst [vmem:[#allocation44_spill] sm:$0xff] %v5633_v25  ;;  %6565 = vst [vmem:[#allocation45_spill] sm:$0xff] %v5637_v5  ;;  %v6574_v5 = vld [vmem:[#allocation143_spill] sm:$0xff]  ;;  %v684_v36 = vadd.f32 %v683_v30, %v669_v8  ;;  %v1953_v17 = vmul.f32 %v6577_v18, %v5307_v37  ;;  %v898_v39 = vadd.f32 %v897_v40, %v883_v7 }
 0x165   :  { %6567 = vst [vmem:[#allocation46_spill] sm:$0xff] %v5641_v23  ;;  %6569 = vst [vmem:[#allocation47_spill] sm:$0xff] %v5645_v55  ;;  %v1311_v38 = vmul.f32 %v6574_v5, %v5307_v37  ;;  %v6575_v23 = vld [vmem:[#allocation144_spill] sm:$0xff]  ;;  %v6576_v55 = vld [vmem:[#allocation145_spill] sm:$0xff]  ;;  %v1112_v27 = vadd.f32 %v1111_v43, %v1097_v33  ;;  %v471_v10 = vadd.f32 %v470_v1, %v6578_v62 }
 0x166   :  { %v1525_v25 = vmul.f32 %v6575_v23, %v5307_v37  ;;  %v1739_v20 = vmul.f32 %v6576_v55, %v5307_v37  ;;  %v685_v0 = vadd.f32 %v684_v36, %v6579_v2  ;;  %v1968_v41 = vadd.f32 %v1967_v24, %v1953_v17  ;;  %v6586_v62 = vld [vmem:[#allocation153_spill] sm:$0xff] }
 0x167   :  { %v1326_v49 = vadd.f32 %v1325_v4, %v1311_v38  ;;  %v899_v23 = vadd.f32 %v898_v39, %v5239_v21  ;;  %v1113_v48 = vadd.f32 %v1112_v27, %v5245_v28  ;;  %v472_v18 = vadd.f32 %v471_v10, %v5371_v31  ;;  %v6580_v31 = vld [vmem:[#allocation147_spill] sm:$0xff]  ;;  %v6592_v17 = vld [vmem:[#allocation21_spill] sm:$0xff]  ;;  %v6593_v10 = vld [vmem:[#allocation22_spill] sm:$0xff] }
 0x168   :  { %v1540_v14 = vadd.f32 %v1539_v53, %v1525_v25  ;;  %v1754_v5 = vadd.f32 %v1753_v22, %v1739_v20  ;;  %v686_v43 = vadd.f32 %v685_v0, %v5377_v52  ;;  %v1969_v40 = vadd.f32 %v1968_v41, %v5269_v29  ;;  %v6581_v52 = vld [vmem:[#allocation148_spill] sm:$0xff]  ;;  %v6582_v29 = vld [vmem:[#allocation149_spill] sm:$0xff] }
 0x169   :  { %v1327_v30 = vadd.f32 %v1326_v49, %v5251_v56  ;;  %v900_v4 = vadd.f32 %v899_v23, %v5383_v32  ;;  %v1114_v22 = vadd.f32 %v1113_v48, %v5389_v61  ;;  %v2167_v24 = vmul.f32 %v6580_v31, %v5307_v37  ;;  %v6583_v32 = vld [vmem:[#allocation150_spill] sm:$0xff]  ;;  %v6594_v23 = vld [vmem:[#allocation23_spill] sm:$0xff]  ;;  %v6601_v31 = vld [vmem:[#allocation69_spill] sm:$0xff] }
 0x16a   :  { %v1541_v55 = vadd.f32 %v1540_v14, %v5257_v26  ;;  %v1755_v53 = vadd.f32 %v1754_v5, %v5263_v35  ;;  %v1970_v26 = vadd.f32 %v1969_v40, %v5413_v60  ;;  %v2381_v35 = vmul.f32 %v6581_v52, %v5307_v37  ;;  %v6602_v52 = vld [vmem:[#allocation157_spill] sm:$0xff] }
 0x16b   :  { %v1328_v21 = vadd.f32 %v1327_v30, %v5395_v51  ;;  %v2595_v41 = vmul.f32 %v6582_v29, %v5307_v37  ;;  %v2809_v61 = vmul.f32 %v6583_v32, %v5307_v37  ;;  %v6584_v51 = vld [vmem:[#allocation151_spill] sm:$0xff]  ;;  %v2182_v2 = vadd.f32 %v2181_v12, %v2167_v24  ;;  %v6605_v32 = vld [vmem:[#allocation158_spill] sm:$0xff] }
 0x16c   :  { %v1542_v28 = vadd.f32 %v1541_v55, %v5401_v47  ;;  %v1756_v56 = vadd.f32 %v1755_v53, %v5407_v19  ;;  %v3023_v0 = vmul.f32 %v6584_v51, %v5307_v37  ;;  %v6585_v47 = vld [vmem:[#allocation152_spill] sm:$0xff]  ;;  %v2396_v60 = vadd.f32 %v2395_v6, %v2381_v35 }
 0x16d   :  { %v3237_v19 = vmul.f32 %v6585_v47, %v5307_v37  ;;  %v6587_v14 = vrot.slane %v6586_v62, %v3784_v54  ;;  %v473_v39 = vadd.f32 %v472_v18, %v5509_v11  ;;  %v2610_v25 = vadd.f32 %v2609_v59, %v2595_v41  ;;  %v6588_v37 = vld [vmem:[#allocation154_spill] sm:$0xff]  ;;  %v6598_v55 = vld [vmem:[#allocation68_spill] sm:$0xff] }
 0x16e   :  { %v2824_v46 = vadd.f32 %v2823_v13, %v2809_v61  ;;  %v3038_v8 = vadd.f32 %v3037_v16, %v3023_v0  ;;  %v2183_v33 = vadd.f32 %v2182_v2, %v5275_v63  ;;  %v2397_v38 = vadd.f32 %v2396_v60, %v5281_v58  ;;  %v6590_v63 = vld [vmem:[#allocation20_spill] sm:$0xff]  ;;  %v6609_v60 = vld [vmem:[#allocation159_spill] sm:$0xff] }
 0x16f   :  { %v460_v27 = vmul.f32 %v6587_v14, %v5193_v57  ;;  %v3252_v7 = vadd.f32 %v3251_v3, %v3237_v19  ;;  %v474_v1 = vadd.f32 %v473_v39, %v5593_v42  ;;  %v6589_v12 = vrot.slane %v6588_v37, %v3784_v54  ;;  %v6591_v3 = vld [vmem:[#allocation25_spill] sm:$0xff]  ;;  %v6599_v53 = vld [vmem:[#allocation156_spill] sm:$0xff]  ;;  %v6608_v19 = vld [vmem:[#allocation27_spill] sm:$0xff] }
 0x170   :  { %v2611_v36 = vadd.f32 %v2610_v25, %v5287_v15  ;;  %v2825_v20 = vadd.f32 %v2824_v46, %v5293_v45  ;;  %v3039_v11 = vadd.f32 %v3038_v8, %v5299_v50  ;;  %v2184_v13 = vadd.f32 %v2183_v33, %v5419_v9  ;;  %v6595_v15 = vld [vmem:[#allocation24_spill] sm:$0xff]  ;;  %v6596_v50 = vld [vmem:[#allocation155_spill] sm:$0xff]  ;;  %v6611_v14 = vld [vmem:[#allocation37_spill] sm:$0xff] }
 0x171   :  { %v674_v6 = vmul.f32 %v6589_v12, %v5193_v57  ;;  %v3253_v59 = vadd.f32 %v3252_v7, %v5305_v44  ;;  %v2398_v16 = vadd.f32 %v2397_v38, %v6590_v63  ;;  %v475_v58 = vadd.f32 %v474_v1, %v460_v27  ;;  %v6607_v0 = vld [vmem:[#allocation36_spill] sm:$0xff]  ;;  %v6612_v39 = vld [vmem:[#allocation38_spill] sm:$0xff]  ;;  %v6616_v1 = vld [vmem:[#allocation39_spill] sm:$0xff] }
 0x172   :  { %v687_v42 = vadd.f32 %v686_v43, %v6591_v3  ;;  %v2612_v49 = vadd.f32 %v2611_v36, %v6592_v17  ;;  %v2826_v5 = vadd.f32 %v2825_v20, %v6593_v10  ;;  %v3040_v48 = vadd.f32 %v3039_v11, %v6594_v23  ;;  %v6614_v8 = vld [vmem:[#allocation160_spill] sm:$0xff]  ;;  %v6622_v10 = vld [vmem:[#allocation41_spill] sm:$0xff] }
 0x173   :  { %v3254_v30 = vadd.f32 %v3253_v59, %v6595_v15  ;;  %v6597_v44 = vrot.slane %v6596_v50, %v3784_v54  ;;  %v901_v18 = vadd.f32 %v900_v4, %v6598_v55  ;;  %v6600_v43 = vrot.slane %v6599_v53, %v3784_v54  ;;  %v6620_v63 = vld [vmem:[#allocation40_spill] sm:$0xff]  ;;  %v6623_v15 = vld [vmem:[#allocation162_spill] sm:$0xff] }
 0x174   :  { %v688_v45 = vadd.f32 %v687_v42, %v5597_v34  ;;  %v1115_v24 = vadd.f32 %v1114_v22, %v6601_v31  ;;  %v6603_v35 = vrot.slane %v6602_v52, %v3784_v54  ;;  %v6604_v34 = vld [vmem:[#allocation26_spill] sm:$0xff]  ;;  %v6606_v61 = vrot.slane %v6605_v32, %v3784_v54 }
 0x175   :  { %v888_v9 = vmul.f32 %v6597_v44, %v5193_v57  ;;  %v1102_v40 = vmul.f32 %v6600_v43, %v5193_v57  ;;  %v1329_v41 = vadd.f32 %v1328_v21, %v6604_v34  ;;  %v902_v47 = vadd.f32 %v901_v18, %v6607_v0  ;;  %v6613_v21 = vld [vmem:[#allocation28_spill] sm:$0xff]  ;;  %v6626_v55 = vld [vmem:[#allocation42_spill] sm:$0xff]  ;;  %v6633_v0 = vld [vmem:[#allocation33_spill] sm:$0xff] }
 0x176   :  { %v1316_v29 = vmul.f32 %v6603_v35, %v5193_v57  ;;  %v1530_v51 = vmul.f32 %v6606_v61, %v5193_v57  ;;  %v689_v4 = vadd.f32 %v688_v45, %v674_v6  ;;  %v1543_v2 = vadd.f32 %v1542_v28, %v6608_v19  ;;  %v6617_v28 = vld [vmem:[#allocation29_spill] sm:$0xff]  ;;  %v6627_v43 = vld [vmem:[#allocation164_spill] sm:$0xff] }
 0x177   :  { %v6610_v22 = vrot.slane %v6609_v60, %v3784_v54  ;;  %v1116_v27 = vadd.f32 %v1115_v24, %v6611_v14  ;;  %v1330_v25 = vadd.f32 %v1329_v41, %v6612_v39  ;;  %v1757_v46 = vadd.f32 %v1756_v56, %v6613_v21  ;;  %v6618_v6 = vld [vmem:[#allocation161_spill] sm:$0xff]  ;;  %v6621_v56 = vld [vmem:[#allocation30_spill] sm:$0xff]  ;;  %v6629_v24 = vld [vmem:[#allocation32_spill] sm:$0xff] }
 0x178   :  { %v6615_v7 = vrot.slane %v6614_v8, %v3784_v54  ;;  %v903_v38 = vadd.f32 %v902_v47, %v888_v9  ;;  %v1544_v37 = vadd.f32 %v1543_v2, %v6616_v1  ;;  %v1971_v12 = vadd.f32 %v1970_v26, %v6617_v28  ;;  %v6625_v26 = vld [vmem:[#allocation31_spill] sm:$0xff]  ;;  %v6631_v41 = vld [vmem:[#allocation165_spill] sm:$0xff]  ;;  %v6634_v19 = vld [vmem:[#allocation44_spill] sm:$0xff] }
 0x179   :  { %v1744_v62 = vmul.f32 %v6610_v22, %v5193_v57  ;;  %v6619_v36 = vrot.slane %v6618_v6, %v3784_v54  ;;  %v1117_v11 = vadd.f32 %v1116_v27, %v1102_v40  ;;  %v1331_v59 = vadd.f32 %v1330_v25, %v1316_v29  ;;  %v6630_v29 = vld [vmem:[#allocation43_spill] sm:$0xff]  ;;  %v6635_v22 = vld [vmem:[#allocation166_spill] sm:$0xff]  ;;  %v6638_v25 = vld [vmem:[#allocation45_spill] sm:$0xff] }
 0x17a   :  { %v1958_v33 = vmul.f32 %v6615_v7, %v5193_v57  ;;  %v1758_v3 = vadd.f32 %v1757_v46, %v6620_v63  ;;  %v2185_v42 = vadd.f32 %v2184_v13, %v6621_v56  ;;  %v1545_v17 = vadd.f32 %v1544_v37, %v1530_v51  ;;  %v6637_v27 = vld [vmem:[#allocation34_spill] sm:$0xff]  ;;  %v6639_v46 = vld [vmem:[#allocation168_spill] sm:$0xff]  ;;  %v6641_v1 = vld [vmem:[#allocation35_spill] sm:$0xff] }
 0x17b   :  { %v2172_v20 = vmul.f32 %v6619_v36, %v5193_v57  ;;  %v1972_v23 = vadd.f32 %v1971_v12, %v6622_v10  ;;  %v6624_v45 = vrot.slane %v6623_v15, %v3784_v54  ;;  %v2399_v44 = vadd.f32 %v2398_v16, %v6625_v26  ;;  %v6642_v28 = vld [vmem:[#allocation46_spill] sm:$0xff]  ;;  %v6643_v36 = vld [vmem:[#allocation17_spill] sm:$0xff] }
 0x17c   :  { %v1759_v9 = vadd.f32 %v1758_v3, %v1744_v62  ;;  %v2186_v18 = vadd.f32 %v2185_v42, %v6626_v55  ;;  %v6628_v40 = vrot.slane %v6627_v43, %v3784_v54  ;;  %v2613_v13 = vadd.f32 %v2612_v49, %v6629_v24  ;;  %v6651_v26 = vld [vmem:[#allocation170_spill] sm:$0xff]  ;;  %v6653_v24 = vld [vmem:[#allocation171_spill] sm:$0xff] }
 0x17d   :  { %v2386_v50 = vmul.f32 %v6624_v45, %v5193_v57  ;;  %v1973_v35 = vadd.f32 %v1972_v23, %v1958_v33  ;;  %v2400_v34 = vadd.f32 %v2399_v44, %v6630_v29  ;;  %v6632_v61 = vrot.slane %v6631_v41, %v3784_v54  ;;  %v6648_v23 = vld [vmem:[#allocation47_spill] sm:$0xff] }
 0x17e   :  { %v2600_v31 = vmul.f32 %v6628_v40, %v5193_v57  ;;  %v2827_v16 = vadd.f32 %v2826_v5, %v6633_v0  ;;  %v2187_v47 = vadd.f32 %v2186_v18, %v2172_v20  ;;  %v2614_v2 = vadd.f32 %v2613_v13, %v6634_v19  ;;  %v6644_v20 = vld [vmem:[#allocation163_spill] sm:$0xff]  ;;  %v6655_v0 = vld [vmem:[#allocation172_spill] sm:$0xff] }
 0x17f   :  { %v2814_v51 = vmul.f32 %v6632_v61, %v5193_v57  ;;  %v6636_v62 = vrot.slane %v6635_v22, %v3784_v54  ;;  %v3041_v49 = vadd.f32 %v3040_v48, %v6637_v27  ;;  %v2401_v39 = vadd.f32 %v2400_v34, %v2386_v50  ;;  %v6646_v48 = vld [vmem:[#allocation167_spill] sm:$0xff] }
 0x180   :  { %v2828_v21 = vadd.f32 %v2827_v16, %v6638_v25  ;;  %v6640_v7 = vrot.slane %v6639_v46, %v3784_v54  ;;  %v3255_v5 = vadd.f32 %v3254_v30, %v6641_v1  ;;  %v2615_v37 = vadd.f32 %v2614_v2, %v2600_v31  ;;  %v6661_v25 = vld [vmem:[#allocation175_spill] sm:$0xff]  ;;  %v6665_v1 = vld [vmem:[#allocation177_spill] sm:$0xff] }
 0x181   :  { %v3028_v14 = vmul.f32 %v6636_v62, %v5193_v57  ;;  %v3042_v12 = vadd.f32 %v3041_v49, %v6642_v28  ;;  %v6645_v63 = vrot.slane %v6644_v20, %v3784_v54  ;;  %v6647_v56 = vrot.slane %v6646_v48, %v3784_v54  ;;  %v6657_v62 = vld [vmem:[#allocation173_spill] sm:$0xff]  ;;  %v6666_v28 = vld [vmem:[#allocation178_spill] sm:$0xff] }
 0x182   :  { %v3242_v33 = vmul.f32 %v6640_v7, %v5193_v57  ;;  %v2829_v10 = vadd.f32 %v2828_v21, %v2814_v51  ;;  %v3256_v45 = vadd.f32 %v3255_v5, %v6648_v23  ;;  %v6649_v57 = vld [vmem:[#allocation169_spill] sm:$0xff]  ;;  %v6652_v44 = vrot.slane %v6651_v26, %v3784_v54  ;;  %v6663_v7 = vld [vmem:[#allocation176_spill] sm:$0xff] }
 0x183   :  { %v461_v3 = vmul.f32 %v6645_v63, %v6643_v36  ;;  %v675_v42 = vmul.f32 %v6647_v56, %v6643_v36  ;;  %v6650_v30 = vrot.slane %v6649_v57, %v3784_v54  ;;  %v3043_v18 = vadd.f32 %v3042_v12, %v3028_v14 }
 0x184   :  { %v1103_v55 = vmul.f32 %v6652_v44, %v6643_v36  ;;  %v6654_v13 = vrot.slane %v6653_v24, %v3784_v54  ;;  %v3257_v34 = vadd.f32 %v3256_v45, %v3242_v33  ;;  %v6656_v16 = vrot.slane %v6655_v0, %v3784_v54 }
 0x185   :  { %v889_v50 = vmul.f32 %v6650_v30, %v6643_v36  ;;  %v476_v40 = vadd.f32 %v475_v58, %v461_v3  ;;  %v690_v31 = vadd.f32 %v689_v4, %v675_v42  ;;  %v6658_v14 = vrot.slane %v6657_v62, %v3784_v54  ;;  %v6659_v4 = vld [vmem:[#allocation174_spill] sm:$0xff]  ;;  %v6667_v42 = vld [vmem:[#allocation179_spill] sm:$0xff] }
 0x186   :  { %v1317_v29 = vmul.f32 %v6654_v13, %v6643_v36  ;;  %v1118_v51 = vadd.f32 %v1117_v11, %v1103_v55  ;;  %v1531_v19 = vmul.f32 %v6656_v16, %v6643_v36  ;;  %v6660_v27 = vrot.slane %v6659_v4, %v3784_v54  ;;  %v6669_v13 = vld [vmem:[#allocation18_spill] sm:$0xff] }
 0x187   :  { %v904_v61 = vadd.f32 %v903_v38, %v889_v50  ;;  %v1745_v58 = vmul.f32 %v6658_v14, %v6643_v36  ;;  %v6662_v38 = vrot.slane %v6661_v25, %v3784_v54  ;;  %v2563_v5 = vrot.slane %v6665_v1, %v3784_v54  ;;  %v6668_v50 = vld [vmem:[#allocation180_spill] sm:$0xff] }
 0x188   :  { %v1332_v2 = vadd.f32 %v1331_v59, %v1317_v29  ;;  %v1959_v49 = vmul.f32 %v6660_v27, %v6643_v36  ;;  %v1546_v21 = vadd.f32 %v1545_v17, %v1531_v19  ;;  %v6664_v59 = vrot.slane %v6663_v7, %v3784_v54  ;;  %v6670_v29 = vld [vmem:[#allocation181_spill] sm:$0xff] }
 0x189   :  { %v2173_v11 = vmul.f32 %v6662_v38, %v6643_v36  ;;  %v2777_v12 = vrot.slane %v6666_v28, %v3784_v54  ;;  %v1760_v63 = vadd.f32 %v1759_v9, %v1745_v58  ;;  %v2991_v23 = vrot.slane %v6667_v42, %v3784_v54  ;;  %v6671_v9 = vld [vmem:[#allocation182_spill] sm:$0xff] }
 0x18a   :  { %v2387_v33 = vmul.f32 %v6664_v59, %v6643_v36  ;;  %v1974_v3 = vadd.f32 %v1973_v35, %v1959_v49  ;;  %v2601_v17 = vmul.f32 %v2563_v5, %v6643_v36  ;;  %v3205_v44 = vrot.slane %v6668_v50, %v3784_v54 }
 0x18b   :  { %v2188_v56 = vadd.f32 %v2187_v47, %v2173_v11  ;;  %v2815_v30 = vmul.f32 %v2777_v12, %v6643_v36  ;;  %v3029_v55 = vmul.f32 %v2991_v23, %v6643_v36  ;;  %v462_v16 = vmul.f32 %v6670_v29, %v6669_v13  ;;  %v6672_v47 = vld [vmem:[#allocation183_spill] sm:$0xff] }
 0x18c   :  { %v2402_v45 = vadd.f32 %v2401_v39, %v2387_v33  ;;  %v676_v35 = vmul.f32 %v6671_v9, %v6669_v13  ;;  %v890_v19 = vmul.f32 %v6672_v47, %v6669_v13  ;;  %v2616_v14 = vadd.f32 %v2615_v37, %v2601_v17 }
 0x18d   :  { %v2830_v39 = vadd.f32 %v2829_v10, %v2815_v30  ;;  %v3243_v58 = vmul.f32 %v3205_v44, %v6643_v36  ;;  %v6673_v27 = vcombine.high %v6599_v53, %v6599_v53  ;;  %v3044_v38 = vadd.f32 %v3043_v18, %v3029_v55 }
 0x18e   :  { %v5849_v11 = vadd.f32 %v476_v40, %v462_v16  ;;  %v5851_v59 = vadd.f32 %v690_v31, %v676_v35  ;;  %v5853_v33 = vadd.f32 %v904_v61, %v890_v19  ;;  %v1221_v37 = vcombine.high %v6602_v52, %v6602_v52 }
 0x18f   :  { %v1069_v49 = vrot.slane %v6673_v27, %v3784_v54  ;;  %v3258_v5 = vadd.f32 %v3257_v34, %v3243_v58  ;;  %v1435_v36 = vcombine.high %v6605_v32, %v6605_v32  ;;  %v1649_v53 = vcombine.high %v6609_v60, %v6609_v60 }
 0x190   :  { %v1863_v10 = vcombine.high %v6614_v8, %v6614_v8  ;;  %v2077_v18 = vcombine.high %v6618_v6, %v6618_v6  ;;  %v2291_v40 = vcombine.high %v6623_v15, %v6623_v15  ;;  %v1283_v34 = vrot.slane %v1221_v37, %v3784_v54 }
 0x191   :  { %v1104_v12 = vmul.f32 %v1069_v49, %v6669_v13  ;;  %v1497_v52 = vrot.slane %v1435_v36, %v3784_v54  ;;  %v2505_v32 = vcombine.high %v6627_v43, %v6627_v43  ;;  %v1711_v61 = vrot.slane %v1649_v53, %v3784_v54 }
 0x192   :  { %v1925_v60 = vrot.slane %v1863_v10, %v3784_v54  ;;  %v2139_v8 = vrot.slane %v2077_v18, %v3784_v54  ;;  %v2353_v23 = vrot.slane %v2291_v40, %v3784_v54  ;;  %v1318_v6 = vmul.f32 %v1283_v34, %v6669_v13  ;;  %v6674_v10 = vld [vmem:[#allocation19_spill] sm:$0xff] }
 0x193   :  { %v1119_v31 = vadd.f32 %v1118_v51, %v1104_v12  ;;  %v1532_v15 = vmul.f32 %v1497_v52, %v6669_v13  ;;  %v2567_v51 = vrot.slane %v2505_v32, %v3784_v54  ;;  %v2719_v17 = vcombine.high %v6631_v41, %v6631_v41 }
 0x194   :  { %v1746_v30 = vmul.f32 %v1711_v61, %v6669_v13  ;;  %v1960_v43 = vmul.f32 %v1925_v60, %v6669_v13  ;;  %v2174_v44 = vmul.f32 %v2139_v8, %v6669_v13  ;;  %v2388_v55 = vmul.f32 %v2353_v23, %v6669_v13 }
 0x195   :  { %v1333_v29 = vadd.f32 %v1332_v2, %v1318_v6  ;;  %v1547_v16 = vadd.f32 %v1546_v21, %v1532_v15  ;;  %v2602_v9 = vmul.f32 %v2567_v51, %v6669_v13  ;;  %v2781_v35 = vrot.slane %v2719_v17, %v3784_v54 }
 0x196   :  { %v5887_v47 = vadd.f32 %v1760_v63, %v1746_v30  ;;  %v5889_v19 = vadd.f32 %v1974_v3, %v1960_v43  ;;  %v5891_v58 = vadd.f32 %v2188_v56, %v2174_v44  ;;  %v5893_v41 = vadd.f32 %v2402_v45, %v2388_v55 }
 0x197   :  { %v5895_v27 = vadd.f32 %v2616_v14, %v2602_v9  ;;  %v2816_v49 = vmul.f32 %v2781_v35, %v6669_v13  ;;  %v2933_v2 = vcombine.high %v6635_v22, %v6635_v22  ;;  %v3147_v21 = vcombine.high %v6639_v46, %v6639_v46 }
 0x198   :  { %v367_v63 = vcombine.high %v6644_v20, %v6644_v20  ;;  %v581_v3 = vcombine.high %v6646_v48, %v6646_v48  ;;  %v795_v56 = vcombine.high %v6649_v57, %v6649_v57  ;;  %v1009_v45 = vcombine.high %v6651_v26, %v6651_v26 }
 0x199   :  { %v5910_v14 = vadd.f32 %v2830_v39, %v2816_v49  ;;  %v2995_v12 = vrot.slane %v2933_v2, %v3784_v54  ;;  %v3209_v22 = vrot.slane %v3147_v21, %v3784_v54  ;;  %v1223_v46 = vcombine.high %v6653_v24, %v6653_v24 }
 0x19a   :  { %v431_v20 = vrot.slane %v367_v63, %v3784_v54  ;;  %v645_v37 = vrot.slane %v581_v3, %v3784_v54  ;;  %v859_v48 = vrot.slane %v795_v56, %v3784_v54  ;;  %v1073_v57 = vrot.slane %v1009_v45, %v3784_v54 }
 0x19b   :  { %v3030_v36 = vmul.f32 %v2995_v12, %v6669_v13  ;;  %v3244_v26 = vmul.f32 %v3209_v22, %v6669_v13  ;;  %v1287_v39 = vrot.slane %v1223_v46, %v3784_v54  ;;  %v1437_v53 = vcombine.high %v6655_v0, %v6655_v0 }
 0x19c   :  { %v463_v18 = vmul.f32 %v431_v20, %v6674_v10  ;;  %v677_v24 = vmul.f32 %v645_v37, %v6674_v10  ;;  %v891_v40 = vmul.f32 %v859_v48, %v6674_v10  ;;  %v1105_v34 = vmul.f32 %v1073_v57, %v6674_v10 }
 0x19d   :  { %v3045_v52 = vadd.f32 %v3044_v38, %v3030_v36  ;;  %v3259_v32 = vadd.f32 %v3258_v5, %v3244_v26  ;;  %v1319_v61 = vmul.f32 %v1287_v39, %v6674_v10  ;;  %v1501_v60 = vrot.slane %v1437_v53, %v3784_v54 }
 0x19e   :  { %v478_v13 = vadd.f32 %v5849_v11, %v463_v18  ;;  %v692_v8 = vadd.f32 %v5851_v59, %v677_v24  ;;  %v906_v0 = vadd.f32 %v5853_v33, %v891_v40  ;;  %v1120_v23 = vadd.f32 %v1119_v31, %v1105_v34 }
 0x19f   :  { %v1334_v6 = vadd.f32 %v1333_v29, %v1319_v61  ;;  %v1533_v15 = vmul.f32 %v1501_v60, %v6674_v10  ;;  %v1651_v51 = vcombine.high %v6657_v62, %v6657_v62  ;;  %v1865_v38 = vcombine.high %v6659_v4, %v6659_v4 }
 0x1a0   :  { %479 = vst [vmem:[#allocation2] sm:$0xff] %v478_v13  ;;  %693 = vst [vmem:[#allocation2 + $0x8] sm:$0xff] %v692_v8  ;;  %v2079_v11 = vcombine.high %v6661_v25, %v6661_v25  ;;  %v2293_v59 = vcombine.high %v6663_v7, %v6663_v7  ;;  %v2507_v33 = vcombine.high %v6665_v1, %v6665_v1 }
 0x1a1   :  { %907 = vst [vmem:[#allocation2 + $0x10] sm:$0xff] %v906_v0  ;;  %1121 = vst [vmem:[#allocation2 + $0x18] sm:$0xff] %v1120_v23  ;;  %v2721_v5 = vcombine.high %v6666_v28, %v6666_v28  ;;  %v1548_v62 = vadd.f32 %v1547_v16, %v1533_v15  ;;  %v1715_v4 = vrot.slane %v1651_v51, %v3784_v54 }
 0x1a2   :  { %1335 = vst [vmem:[#allocation2 + $0x20] sm:$0xff] %v1334_v6  ;;  %v1929_v31 = vrot.slane %v1865_v38, %v3784_v54  ;;  %v2935_v17 = vcombine.high %v6667_v42, %v6667_v42  ;;  %v2143_v25 = vrot.slane %v2079_v11, %v3784_v54  ;;  %v2357_v30 = vrot.slane %v2293_v59, %v3784_v54 }
 0x1a3   :  { %v2571_v7 = vrot.slane %v2507_v33, %v3784_v54  ;;  %v2785_v1 = vrot.slane %v2721_v5, %v3784_v54  ;;  %1549 = vst [vmem:[#allocation2 + $0x28] sm:$0xff] %v1548_v62  ;;  %v1747_v28 = vmul.f32 %v1715_v4, %v6674_v10  ;;  %v3149_v55 = vcombine.high %v6668_v50, %v6668_v50 }
 0x1a4   :  { %v1961_v43 = vmul.f32 %v1929_v31, %v6674_v10  ;;  %v2999_v44 = vrot.slane %v2935_v17, %v3784_v54  ;;  %v2175_v42 = vmul.f32 %v2143_v25, %v6674_v10  ;;  %v2389_v29 = vmul.f32 %v2357_v30, %v6674_v10 }
 0x1a5   :  { %v2603_v16 = vmul.f32 %v2571_v7, %v6674_v10  ;;  %v2817_v9 = vmul.f32 %v2785_v1, %v6674_v10  ;;  %v1762_v35 = vadd.f32 %v5887_v47, %v1747_v28  ;;  %v3213_v21 = vrot.slane %v3149_v55, %v3784_v54 }
 0x1a6   :  { %v1976_v49 = vadd.f32 %v5889_v19, %v1961_v43  ;;  %v3031_v2 = vmul.f32 %v2999_v44, %v6674_v10  ;;  %v2190_v50 = vadd.f32 %v5891_v58, %v2175_v42  ;;  %v2404_v63 = vadd.f32 %v5893_v41, %v2389_v29 }
 0x1a7   :  { %v2618_v3 = vadd.f32 %v5895_v27, %v2603_v16  ;;  %v2832_v56 = vadd.f32 %v5910_v14, %v2817_v9  ;;  %1763 = vst [vmem:[#allocation2 + $0x30] sm:$0xff] %v1762_v35  ;;  %v3245_v47 = vmul.f32 %v3213_v21, %v6674_v10 }
 0x1a8   :  { %1977 = vst [vmem:[#allocation2 + $0x38] sm:$0xff] %v1976_v49  ;;  %v3046_v45 = vadd.f32 %v3045_v52, %v3031_v2  ;;  %2191 = vst [vmem:[#allocation2 + $0x40] sm:$0xff] %v2190_v50 }
 0x1a9   :  { %2405 = vst [vmem:[#allocation2 + $0x48] sm:$0xff] %v2404_v63  ;;  %2619 = vst [vmem:[#allocation2 + $0x50] sm:$0xff] %v2618_v3  ;;  %v3260_v54 = vadd.f32 %v3259_v32, %v3245_v47 }
 0x1aa   :  { %2833 = vst [vmem:[#allocation2 + $0x58] sm:$0xff] %v2832_v56  ;;  %3047 = vst [vmem:[#allocation2 + $0x60] sm:$0xff] %v3046_v45 }
 0x1ab   :  { %3261 = vst [vmem:[#allocation2 + $0x68] sm:$0xff] %v3260_v54 }
 0x1ac   :  { %3422 = shalt.err (!%p3419_p4)
}
 0x1ad   :  { %s3423_s19 = scalar_lea.hbm %s5987_s2, 1792 }
 0x1ae   :  { %p3424_p5 = scmp.ne.s32.totalorder %s5987_s2, %s3423_s19  ;;  %p3427_p6 = scmp.lt.u32.totalorder %s3423_s19, %s5987_s2 }
 0x1b0   :  { %p3429_p7 = pnand %p3427_p6, %p3424_p5 }
 0x1b2   :  { %3432 = shalt.err (!%p3429_p7)
}
 0x1b3   :  { %s3438_s24 = smov 128   ;;  %s3439_s25 = smov 8  }
 0x1b4   :  { %3273 = dma.vmem_to_hbm [thread:$0]  %s3268_s16, 1792, %s5987_s2, [#allocation3], %s3438_s24, %s3438_s24, %s3439_s25  }
 0x1b5   :  { %3433 = dma.done.wait [#allocation3], 1792  }
 0x1b6   :  { %3434 = vsyncadd [#allocation3], 4294965504 }
 0x1b7   :  { %3277 = vsyncpa [#allocation3], 1 }

</bundles_post_ra>
